<compile_context>
chip_gen: v7x
topology: tpu7x:2x2x1
jax: 0.10.0
libtpu: 0.0.40
codegen_flags: <defaults>
</compile_context>

<pallas_src>
import functools

import jax
import jax.numpy as jnp
from jax.experimental import pallas as pl
from jax.experimental.pallas import tpu as pltpu

EPS = 1e-8  # matches ProductOfExperts eps


# --------------------------------------------------------------------------
# Packed parameter layout
#
# w_in  : (img_dim, 256)        bf16  ImageEncoder.fc1                  (VMEM)
# w_enc : (256, 384)            bf16  [ie_fc2 | ie_fc31|fc32 (pad128)]  (VMEM)
# w64   : (64, 640)             bf16  blocks of 128 lanes, shared:      (VMEM)
#           [  0:128) te_fc2 (0:64)          | blkdiag(bd_fc2_s, bd_fc2_a)
#           [128:256) te_fc31|fc32 (0:2L)    | blkdiag(bd_fc3_s, bd_fc3_a)
#           [256:640) id_fc1 | bd_fc1_s | bd_fc1_a | (sm head 576:581,
#                                                     angle head 581:582)
# misc  : (16, 256)             f32   all small biases, te_fc1 rows,
#                                     angle/sm bias, friction_coeff     (VMEM)
# b_img : (1, img_dim)          f32   ImageDecoder.fc4 bias             (VMEM)
# w_dec : (256, 512 + img_dim)  bf16  [id_fc2 | id_fc3 | id_fc4]        (HBM,
#                                     manually DMA'd -> overlapped)
# --------------------------------------------------------------------------


def make_mvae_kernel(L, img_dim):
    TWO_L = 2 * L

    def kernel(x_ref, sin_ref, w_in_ref, w_enc_ref, w64_ref, misc_ref,
               b_img_ref, w_dec_hbm, img_out_ref, small_out_ref,
               w_dec_vmem, dec_sem):
        B = x_ref.shape[0]

        # -------- start the decoder-weight fetch before any compute --------
        dec_cp = pltpu.make_async_copy(w_dec_hbm, w_dec_vmem, dec_sem)
        dec_cp.start()

        def mm(a, w):
            # MXU-native bf16 x bf16 matmul with f32 accumulation.
            return jnp.dot(a.astype(jnp.bfloat16), w,
                           preferred_element_type=jnp.float32)

        def bias(row, width):
            return misc_ref[row:row + 1, 0:width]          # (1, width), f32

        def swish(v):
            return v * jax.nn.sigmoid(v)

        # ---------------- ImageEncoder: q(z | image) ----------------
        h = swish(mm(x_ref[...], w_in_ref[...]) + bias(0, 256))
        h = swish(mm(h, w_enc_ref[:, 0:256]) + bias(1, 256))
        ie_head = mm(h, w_enc_ref[:, 256:256 + TWO_L]) + bias(2, TWO_L)
        img_mu, img_logvar = ie_head[:, 0:L], ie_head[:, L:TWO_L]

        # ---------------- TextEncoder: q(z | text) ----------------
        # fc1 has K=2 -> two VPU broadcast-FMAs instead of an MXU round trip.
        t0 = sin_ref[:, 0:1]
        t1 = sin_ref[:, 1:2]
        ht = t0 * misc_ref[13:14, 0:64] + t1 * misc_ref[14:15, 0:64] + bias(3, 64)
        ht = mm(ht, w64_ref[:, 0:128])[:, 0:64] + bias(4, 64)        # te.fc2
        te_head = mm(ht, w64_ref[:, 128:256])[:, 0:TWO_L] + bias(5, TWO_L)
        txt_mu, txt_logvar = te_head[:, 0:L], te_head[:, L:TWO_L]

        # -------- Product of Experts (prior, image, text) — exact math -----
        # prior expert: logvar = 0 -> T = 1/(exp(0)+2*eps), a constant.
        t_prior = 1.0 / (1.0 + 2.0 * EPS)
        t_img = 1.0 / (jnp.exp(img_logvar) + 2.0 * EPS)
        t_txt = 1.0 / (jnp.exp(txt_logvar) + 2.0 * EPS)
        pd_var = 1.0 / (t_prior + t_img + t_txt)
        pd_mu = (img_mu * t_img + txt_mu * t_txt) * pd_var
        pd_logvar = jnp.log(pd_var + EPS)

        # ---------------- reparametrize (training semantics) ---------------
        eps_noise = sin_ref[:, 2:2 + L]
        z = pd_mu + eps_noise * jnp.exp(0.5 * pd_logvar)

        # ---- fused z matmul: [ImageDecoder.fc1 | BinaryDecoder.fc1_s|fc1_a]
        zc = jnp.concatenate([z, jnp.zeros((B, 64 - L), jnp.float32)], axis=-1)
        zr = mm(zc, w64_ref[:, 256:640])                    # (B, 384)
        hd = swish(zr[:, 0:256] + bias(6, 256))
        hsa = zr[:, 256:320] + bias(9, 64)                  # [h_s | h_a]

        # ---------------- BinaryDecoder: p(y | z) ----------------
        # Independent of the big decoder slab -> runs while the w_dec DMA is
        # still in flight.  Block-diagonal s/a stacks (no activations, per
        # reference); block-diag weights share 128-lane blocks with the text
        # encoder weights (different LHS, different output lanes).
        hsa = mm(hsa, w64_ref[:, 0:128])[:, 64:128] + bias(10, 64)    # fc2
        hsa = mm(hsa, w64_ref[:, 128:256])[:, 64:128] + bias(11, 64)  # fc3
        head = mm(hsa, w64_ref[:, 256:640])                 # reuses z-RHS slab
        sm_logits = head[:, 320:325] + misc_ref[12:13, 0:5]
        angle = head[:, 325:326] + misc_ref[12:13, 8:9]
        e = jnp.exp(sm_logits - jnp.max(sm_logits, axis=-1, keepdims=True))
        slope_material = e / jnp.sum(e, axis=-1, keepdims=True)
        friction = jnp.sum(slope_material * misc_ref[12:13, 16:21],
                           axis=-1, keepdims=True)          # (B, 1)
        label = jnp.concatenate(
            [friction * jnp.cos(angle), jnp.sin(angle)], axis=-1)
        txt_prob = jax.nn.sigmoid(label)                    # (B, 2)

        # ---- lane-dense packed small output: [mu | logvar | txt_prob | 0] --
        pad = jnp.zeros((B, 128 - (TWO_L + 2)), jnp.float32)
        small_out_ref[...] = jnp.concatenate(
            [pd_mu, pd_logvar, txt_prob, pad], axis=-1)     # (B, 128)

        # ---------------- ImageDecoder: p(x | z) ----------------
        dec_cp.wait()                                       # decoder weights now in VMEM
        hd = swish(mm(hd, w_dec_vmem[:, 0:256]) + bias(7, 256))
        hd = swish(mm(hd, w_dec_vmem[:, 256:512]) + bias(8, 256))
        img_out_ref[...] = (mm(hd, w_dec_vmem[:, 512:512 + img_dim])
                            + b_img_ref[...])

    return kernel


# --------------------------------------------------------------------------
# Parameter init (PyTorch nn.Linear-style uniform) and packing.
# --------------------------------------------------------------------------

def init_raw_params(key, n_latents, nc, nv, nh):
    img_dim = nc * nv * nh
    L = n_latents
    specs = [
        ("ie_w1", img_dim, 256), ("ie_w2", 256, 256),
        ("ie_w31", 256, L), ("ie_w32", 256, L),
        ("te_w1", 2, 64), ("te_w2", 64, 64),
        ("te_w31", 64, L), ("te_w32", 64, L),
        ("id_w1", L, 256), ("id_w2", 256, 256),
        ("id_w3", 256, 256), ("id_w4", 256, img_dim),
        ("bd_w1s", L, 32), ("bd_w2s", 32, 32), ("bd_w3s", 32, 32),
        ("bd_w1a", L, 32), ("bd_w2a", 32, 32), ("bd_w3a", 32, 32),
        ("bd_wang", 32, 1), ("bd_wsm", 32, 5),
    ]
    params = {}
    keys = jax.random.split(key, 2 * len(specs))
    for i, (name, fan_in, fan_out) in enumerate(specs):
        bound = float(fan_in) ** -0.5
        params[name] = jax.random.uniform(
            keys[2 * i], (fan_in, fan_out), jnp.float32, -bound, bound)
        params[name.replace("_w", "_b")] = jax.random.uniform(
            keys[2 * i + 1], (fan_out,), jnp.float32, -bound, bound)
    # friction_coeff = ones(1,5) * 0.0
    params["bd_fric"] = jnp.zeros((5,), jnp.float32)
    return params


def pack_params(raw, n_latents, img_dim):
    L = n_latents
    f32 = jnp.float32
    bf16 = jnp.bfloat16

    w_in = raw["ie_w1"].astype(bf16)                         # (img_dim, 256)

    # Encoder slab (VMEM input): [ie_fc2 | ie heads (pad to 128 lanes)].
    w_enc = jnp.zeros((256, 384), f32)
    w_enc = w_enc.at[:, 0:256].set(raw["ie_w2"])
    w_enc = w_enc.at[:, 256:256 + 2 * L].set(
        jnp.concatenate([raw["ie_w31"], raw["ie_w32"]], axis=1))
    w_enc = w_enc.astype(bf16)

    # Decoder slab (HBM operand, DMA'd inside the kernel, overlapped).
    w_dec = jnp.zeros((256, 512 + img_dim), f32)
    w_dec = w_dec.at[:, 0:256].set(raw["id_w2"])
    w_dec = w_dec.at[:, 256:512].set(raw["id_w3"])
    w_dec = w_dec.at[:, 512:512 + img_dim].set(raw["id_w4"])
    w_dec = w_dec.astype(bf16)

    # 64-row slab, 640 columns.  Every matmul RHS slice starts at a multiple
    # of 128 lanes; weights with different LHS share the same 128-lane block.
    w64 = jnp.zeros((64, 640), f32)
    # block [0:128): te.fc2 | blkdiag(bd.fc2_s, bd.fc2_a)
    w64 = w64.at[0:64, 0:64].set(raw["te_w2"])
    w64 = w64.at[0:32, 64:96].set(raw["bd_w2s"])
    w64 = w64.at[32:64, 96:128].set(raw["bd_w2a"])
    # block [128:256): te heads | blkdiag(bd.fc3_s, bd.fc3_a)
    w64 = w64.at[0:64, 128:128 + 2 * L].set(
        jnp.concatenate([raw["te_w31"], raw["te_w32"]], axis=1))
    w64 = w64.at[0:32, 192:224].set(raw["bd_w3s"])
    w64 = w64.at[32:64, 224:256].set(raw["bd_w3a"])
    # block [256:640): fused z matmul [id.fc1 | bd.fc1_s | bd.fc1_a]
    #                  + angle/softmax head weights in the free tail.
    w64 = w64.at[0:L, 256:512].set(raw["id_w1"])
    w64 = w64.at[0:L, 512:544].set(raw["bd_w1s"])
    w64 = w64.at[0:L, 544:576].set(raw["bd_w1a"])
    w64 = w64.at[0:32, 576:581].set(raw["bd_wsm"])
    w64 = w64.at[32:64, 581:582].set(raw["bd_wang"])
    w64 = w64.astype(bf16)

    # Small f32 bias / vector slab (16, 256).
    misc = jnp.zeros((16, 256), f32)
    misc = misc.at[0, 0:256].set(raw["ie_b1"])
    misc = misc.at[1, 0:256].set(raw["ie_b2"])
    misc = misc.at[2, 0:2 * L].set(jnp.concatenate([raw["ie_b31"], raw["ie_b32"]]))
    misc = misc.at[3, 0:64].set(raw["te_b1"])
    misc = misc.at[4, 0:64].set(raw["te_b2"])
    misc = misc.at[5, 0:2 * L].set(jnp.concatenate([raw["te_b31"], raw["te_b32"]]))
    misc = misc.at[6, 0:256].set(raw["id_b1"])
    misc = misc.at[7, 0:256].set(raw["id_b2"])
    misc = misc.at[8, 0:256].set(raw["id_b3"])
    misc = misc.at[9, 0:64].set(jnp.concatenate([raw["bd_b1s"], raw["bd_b1a"]]))
    misc = misc.at[10, 0:64].set(jnp.concatenate([raw["bd_b2s"], raw["bd_b2a"]]))
    misc = misc.at[11, 0:64].set(jnp.concatenate([raw["bd_b3s"], raw["bd_b3a"]]))
    misc = misc.at[12, 0:5].set(raw["bd_bsm"])               # slope_material bias
    misc = misc.at[12, 8].set(raw["bd_bang"][0])             # angle_fc bias
    misc = misc.at[12, 16:21].set(raw["bd_fric"])            # friction_coeff
    misc = misc.at[13, 0:64].set(raw["te_w1"][0])            # te.fc1 row 0
    misc = misc.at[14, 0:64].set(raw["te_w1"][1])            # te.fc1 row 1

    b_img = raw["id_b4"].reshape(1, img_dim).astype(f32)     # id.fc4 bias

    return dict(w_in=w_in, w_enc=w_enc, w64=w64, misc=misc,
                b_img=b_img, w_dec=w_dec)


# --------------------------------------------------------------------------
# Forward wrapper
# --------------------------------------------------------------------------

@functools.partial(jax.jit, static_argnames=("n_latents",))
def mvae_forward(image, text, eps_noise, packed, n_latents):
    B = image.shape[0]
    img_dim = image.shape[1] * image.shape[2] * image.shape[3]
    L = n_latents
    assert 1 <= L <= 32, "packed layout assumes n_latents <= 32"

    x = image.reshape(B, img_dim).astype(jnp.float32)   # x.reshape(-1, nc*nv*nh)
    t = text.reshape(B, 2).astype(jnp.float32)          # squeeze(1) of (B,1,2)

    # Small lane-dense input slab: [text(2) | eps(L) | pad].
    sin = jnp.zeros((B, 128), jnp.float32)
    sin = sin.at[:, 0:2].set(t)
    sin = sin.at[:, 2:2 + L].set(eps_noise.astype(jnp.float32))

    inputs = (x, sin, packed["w_in"], packed["w_enc"], packed["w64"],
              packed["misc"], packed["b_img"], packed["w_dec"])

    out_shape = (
        jax.ShapeDtypeStruct((B, img_dim), jnp.float32),   # img_recon
        jax.ShapeDtypeStruct((B, 128), jnp.float32),       # [mu|logvar|txt|pad]
    )

    vmem = pltpu.MemorySpace.VMEM
    in_specs = ([pl.BlockSpec(memory_space=vmem)] * 7
                + [pl.BlockSpec(memory_space=pl.ANY)])     # w_dec stays in HBM
    out_specs = [pl.BlockSpec(memory_space=vmem)] * 2

    mm_kn = [(img_dim, 256), (256, 256), (256, 2 * L),     # image encoder
             (64, 128), (64, 128),                         # text encoder
             (64, 384),                                    # fused z matmul
             (64, 128), (64, 128), (64, 384),              # binary decoder
             (256, 256), (256, 256), (256, img_dim)]       # image decoder
    flops = 2 * B * sum(k * n for k, n in mm_kn)
    bytes_accessed = sum(int(a.size) * a.dtype.itemsize for a in inputs) \
        + B * (img_dim + 128) * 4
    cost = pl.CostEstimate(flops=int(flops), transcendentals=int(B * 1600),
                           bytes_accessed=int(bytes_accessed))

    # Guard the VMEM budget for large img_dim (v7x has 64 MiB, 32 MiB scoped
    # by default).  At the default img_dim this stays on the default limit.
    vmem_est = (sum(int(a.size) * a.dtype.itemsize for a in inputs[:-1])
                + 2 * 256 * (512 + img_dim)                # w_dec scratch
                + B * (img_dim + 128) * 4)
    call_kwargs = {}
    if 2 * vmem_est > (24 << 20):
        call_kwargs["compiler_params"] = pltpu.CompilerParams(
            vmem_limit_bytes=min(2 * vmem_est + (8 << 20), 128 << 20))

    img_recon, small = pl.pallas_call(
        make_mvae_kernel(L, img_dim),
        out_shape=out_shape,
        in_specs=in_specs,
        out_specs=out_specs,
        scratch_shapes=[
            pltpu.VMEM((256, 512 + img_dim), jnp.bfloat16),  # decoder weights
            pltpu.SemaphoreType.DMA,                         # its DMA semaphore
        ],
        cost_estimate=cost,
        **call_kwargs,
    )(*inputs)

    mu = small[:, 0:L]
    logvar = small[:, L:2 * L]
    txt_recon = small[:, 2 * L:2 * L + 2]
    return img_recon, txt_recon, mu, logvar


# --------------------------------------------------------------------------
# Pure-JAX f32 reference (mirrors MVAE.forward in training mode)
# --------------------------------------------------------------------------

def mvae_reference(raw, image, text, eps_noise, L):
    hd = lambda a, b: jnp.dot(a, b, precision=jax.lax.Precision.HIGHEST)
    swish = lambda v: v * jax.nn.sigmoid(v)
    B = image.shape[0]
    x = image.reshape(B, -1)
    t = text.reshape(B, 2)
    # image encoder
    h = swish(hd(x, raw["ie_w1"]) + raw["ie_b1"])
    h = swish(hd(h, raw["ie_w2"]) + raw["ie_b2"])
    img_mu = hd(h, raw["ie_w31"]) + raw["ie_b31"]
    img_lv = hd(h, raw["ie_w32"]) + raw["ie_b32"]
    # text encoder
    ht = hd(t, raw["te_w1"]) + raw["te_b1"]
    ht = hd(ht, raw["te_w2"]) + raw["te_b2"]
    txt_mu = hd(ht, raw["te_w31"]) + raw["te_b31"]
    txt_lv = hd(ht, raw["te_w32"]) + raw["te_b32"]
    # product of experts (with the N(0,1) prior expert)
    mu_s = jnp.stack([jnp.zeros_like(img_mu), img_mu, txt_mu])
    lv_s = jnp.stack([jnp.zeros_like(img_lv), img_lv, txt_lv])
    T = 1.0 / (jnp.exp(lv_s) + EPS + EPS)
    pd_mu = jnp.sum(mu_s * T, axis=0) / jnp.sum(T, axis=0)
    pd_var = 1.0 / jnp.sum(T, axis=0)
    pd_logvar = jnp.log(pd_var + EPS)
    z = pd_mu + eps_noise * jnp.exp(0.5 * pd_logvar)
    # image decoder
    d = swish(hd(z, raw["id_w1"]) + raw["id_b1"])
    d = swish(hd(d, raw["id_w2"]) + raw["id_b2"])
    d = swish(hd(d, raw["id_w3"]) + raw["id_b3"])
    img_recon = hd(d, raw["id_w4"]) + raw["id_b4"]
    # binary decoder
    h_s = hd(z, raw["bd_w1s"]) + raw["bd_b1s"]
    h_s = hd(h_s, raw["bd_w2s"]) + raw["bd_b2s"]
    h_s = hd(h_s, raw["bd_w3s"]) + raw["bd_b3s"]
    h_a = hd(z, raw["bd_w1a"]) + raw["bd_b1a"]
    h_a = hd(h_a, raw["bd_w2a"]) + raw["bd_b2a"]
    h_a = hd(h_a, raw["bd_w3a"]) + raw["bd_b3a"]
    angle = hd(h_a, raw["bd_wang"]) + raw["bd_bang"]
    sm = jax.nn.softmax(hd(h_s, raw["bd_wsm"]) + raw["bd_bsm"], axis=-1)
    friction = jnp.sum(sm * raw["bd_fric"], axis=-1, keepdims=True)
    label = jnp.concatenate([friction * jnp.cos(angle), jnp.sin(angle)], axis=-1)
    txt_recon = jax.nn.sigmoid(label)
    return img_recon, txt_recon, pd_mu, pd_logvar


if __name__ == "__main__":
    B, nc, nv, nh = 8, 4, 16, 16
    n_latents = 8

    key = jax.random.PRNGKey(0)
    k_param, k_img, k_txt, k_eps = jax.random.split(key, 4)

    raw = init_raw_params(k_param, n_latents, nc, nv, nh)
    packed = pack_params(raw, n_latents, nc * nv * nh)

    image = jax.random.uniform(k_img, (B, nc, nv, nh), jnp.float32)   # NCHW
    text = jax.random.normal(k_txt, (B, 1, 2), jnp.float32)
    # TODO(synk): torch normal_() RNG stream is not reproducible; noise is
    # supplied from JAX PRNG (training-mode reparametrization semantics).
    eps_noise = jax.random.normal(k_eps, (B, n_latents), jnp.float32)

    img_recon, txt_recon, mu, logvar = jax.block_until_ready(
        mvae_forward(image, text, eps_noise, packed, n_latents)
    )

    assert img_recon.shape == (B, nc * nv * nh)
    assert txt_recon.shape == (B, 2)
    assert mu.shape == (B, n_latents) and logvar.shape == (B, n_latents)
    assert bool(jnp.all(jnp.isfinite(img_recon)))
    assert bool(jnp.all(jnp.isfinite(txt_recon)))

    # Numerical check against an f32 reference (weights are bf16 in-kernel,
    # so use a realistic tolerance rather than bitwise equality).
    ref = mvae_reference(raw, image, text, eps_noise, n_latents)
    for got, want, tol in zip((img_recon, txt_recon, mu, logvar),
                              ref, (0.10, 0.05, 0.05, 0.05)):
        err = float(jnp.max(jnp.abs(got - want)))
        assert err < tol, f"max abs error {err} exceeds {tol}"

    print("KERNEL_OK")
</pallas_src>

<mosaic_0001>
module attributes {stable_mosaic.version = 11 : i64} {
  func.func @kernel(%arg0: memref<8x1024xf32, #tpu.memory_space<vmem>>, %arg1: memref<8x128xf32, #tpu.memory_space<vmem>>, %arg2: memref<1024x256xbf16, #tpu.memory_space<vmem>>, %arg3: memref<256x384xbf16, #tpu.memory_space<vmem>>, %arg4: memref<64x640xbf16, #tpu.memory_space<vmem>>, %arg5: memref<16x256xf32, #tpu.memory_space<vmem>>, %arg6: memref<1x1024xf32, #tpu.memory_space<vmem>>, %arg7: memref<256x1536xbf16, #tpu.memory_space<any>>, %arg8: memref<8x1024xf32, #tpu.memory_space<vmem>>, %arg9: memref<8x128xf32, #tpu.memory_space<vmem>>, %arg10: memref<256x1536xbf16, #tpu.memory_space<vmem>>, %arg11: memref<!tpu.dma_semaphore, #tpu.memory_space<semaphore_mem>>) attributes {dimension_semantics = [], scalar_prefetch = 0 : i64, scratch_operands = 2 : i64, tpu.core_type = #tpu.core_type<tc>} {
    tpu.enqueue_dma source(%arg7 : memref<256x1536xbf16, #tpu.memory_space<any>>) target(%arg10 : memref<256x1536xbf16, #tpu.memory_space<vmem>>) target_semaphore(%arg11 : memref<!tpu.dma_semaphore, #tpu.memory_space<semaphore_mem>>)
    %c0 = arith.constant 0 : index
    %c0_0 = arith.constant 0 : index
    %0 = vector.load %arg0[%c0, %c0_0] : memref<8x1024xf32, #tpu.memory_space<vmem>>, vector<8x1024xf32>
    %c0_1 = arith.constant 0 : index
    %c0_2 = arith.constant 0 : index
    %1 = vector.load %arg2[%c0_1, %c0_2] : memref<1024x256xbf16, #tpu.memory_space<vmem>>, vector<1024x256xbf16>
    %2 = arith.truncf %0 : vector<8x1024xf32> to vector<8x1024xbf16>
    %cst = arith.constant dense<0.000000e+00> : vector<8x256xf32>
    %3 = tpu.matmul %2, %1, %cst {dimension_numbers = #tpu.dot_dimension_numbers<[1], [0], [0], [1], [0, 0, 1, 1], [], []>} : vector<8x1024xbf16>, vector<1024x256xbf16>, vector<8x256xf32> -> vector<8x256xf32>
    %c0_3 = arith.constant 0 : index
    %c0_4 = arith.constant 0 : index
    %4 = vector.load %arg5[%c0_3, %c0_4] : memref<16x256xf32, #tpu.memory_space<vmem>>, vector<1x256xf32>
    %5 = vector.broadcast %4 : vector<1x256xf32> to vector<8x256xf32>
    %6 = arith.addf %3, %5 : vector<8x256xf32>
    %7 = arith.negf %6 : vector<8x256xf32>
    %8 = math.exp %7 : vector<8x256xf32>
    %cst_5 = arith.constant 1.000000e+00 : f32
    %9 = vector.broadcast %cst_5 : f32 to vector<8x256xf32>
    %10 = arith.addf %9, %8 : vector<8x256xf32>
    %11 = arith.divf %9, %10 : vector<8x256xf32>
    %12 = arith.mulf %6, %11 : vector<8x256xf32>
    %c0_6 = arith.constant 0 : index
    %c0_7 = arith.constant 0 : index
    %13 = vector.load %arg3[%c0_6, %c0_7] : memref<256x384xbf16, #tpu.memory_space<vmem>>, vector<256x256xbf16>
    %14 = arith.truncf %12 : vector<8x256xf32> to vector<8x256xbf16>
    %cst_8 = arith.constant dense<0.000000e+00> : vector<8x256xf32>
    %15 = tpu.matmul %14, %13, %cst_8 {dimension_numbers = #tpu.dot_dimension_numbers<[1], [0], [0], [1], [0, 0, 1, 1], [], []>} : vector<8x256xbf16>, vector<256x256xbf16>, vector<8x256xf32> -> vector<8x256xf32>
    %c1 = arith.constant 1 : index
    %c0_9 = arith.constant 0 : index
    %16 = vector.load %arg5[%c1, %c0_9] : memref<16x256xf32, #tpu.memory_space<vmem>>, vector<1x256xf32>
    %17 = vector.broadcast %16 : vector<1x256xf32> to vector<8x256xf32>
    %18 = arith.addf %15, %17 : vector<8x256xf32>
    %19 = arith.negf %18 : vector<8x256xf32>
    %20 = math.exp %19 : vector<8x256xf32>
    %cst_10 = arith.constant 1.000000e+00 : f32
    %21 = vector.broadcast %cst_10 : f32 to vector<8x256xf32>
    %22 = arith.addf %21, %20 : vector<8x256xf32>
    %23 = arith.divf %21, %22 : vector<8x256xf32>
    %24 = arith.mulf %18, %23 : vector<8x256xf32>
    %c0_11 = arith.constant 0 : index
    %c256 = arith.constant 256 : index
    %25 = vector.load %arg3[%c0_11, %c256] : memref<256x384xbf16, #tpu.memory_space<vmem>>, vector<256x16xbf16>
    %26 = arith.truncf %24 : vector<8x256xf32> to vector<8x256xbf16>
    %cst_12 = arith.constant dense<0.000000e+00> : vector<8x16xf32>
    %27 = tpu.matmul %26, %25, %cst_12 {dimension_numbers = #tpu.dot_dimension_numbers<[1], [0], [0], [1], [0, 0, 1, 1], [], []>} : vector<8x256xbf16>, vector<256x16xbf16>, vector<8x16xf32> -> vector<8x16xf32>
    %c2 = arith.constant 2 : index
    %c0_13 = arith.constant 0 : index
    %28 = vector.load %arg5[%c2, %c0_13] : memref<16x256xf32, #tpu.memory_space<vmem>>, vector<1x16xf32>
    %29 = vector.broadcast %28 : vector<1x16xf32> to vector<8x16xf32>
    %30 = arith.addf %27, %29 : vector<8x16xf32>
    %31 = vector.extract_strided_slice %30 {offsets = [0, 0], sizes = [8, 8], strides = [1, 1]} : vector<8x16xf32> to vector<8x8xf32>
    %32 = vector.extract_strided_slice %30 {offsets = [0, 8], sizes = [8, 8], strides = [1, 1]} : vector<8x16xf32> to vector<8x8xf32>
    %c0_14 = arith.constant 0 : index
    %c0_15 = arith.constant 0 : index
    %33 = vector.load %arg1[%c0_14, %c0_15] : memref<8x128xf32, #tpu.memory_space<vmem>>, vector<8x1xf32>
    %c0_16 = arith.constant 0 : index
    %c1_17 = arith.constant 1 : index
    %34 = vector.load %arg1[%c0_16, %c1_17] : memref<8x128xf32, #tpu.memory_space<vmem>>, vector<8x1xf32>
    %c13 = arith.constant 13 : index
    %c0_18 = arith.constant 0 : index
    %35 = vector.load %arg5[%c13, %c0_18] : memref<16x256xf32, #tpu.memory_space<vmem>>, vector<1x64xf32>
    %36 = vector.broadcast %33 : vector<8x1xf32> to vector<8x64xf32>
    %37 = vector.broadcast %35 : vector<1x64xf32> to vector<8x64xf32>
    %38 = arith.mulf %36, %37 : vector<8x64xf32>
    %c14 = arith.constant 14 : index
    %c0_19 = arith.constant 0 : index
    %39 = vector.load %arg5[%c14, %c0_19] : memref<16x256xf32, #tpu.memory_space<vmem>>, vector<1x64xf32>
    %40 = vector.broadcast %34 : vector<8x1xf32> to vector<8x64xf32>
    %41 = vector.broadcast %39 : vector<1x64xf32> to vector<8x64xf32>
    %42 = arith.mulf %40, %41 : vector<8x64xf32>
    %43 = arith.addf %38, %42 : vector<8x64xf32>
    %c3 = arith.constant 3 : index
    %c0_20 = arith.constant 0 : index
    %44 = vector.load %arg5[%c3, %c0_20] : memref<16x256xf32, #tpu.memory_space<vmem>>, vector<1x64xf32>
    %45 = vector.broadcast %44 : vector<1x64xf32> to vector<8x64xf32>
    %46 = arith.addf %43, %45 : vector<8x64xf32>
    %c0_21 = arith.constant 0 : index
    %c0_22 = arith.constant 0 : index
    %47 = vector.load %arg4[%c0_21, %c0_22] : memref<64x640xbf16, #tpu.memory_space<vmem>>, vector<64x128xbf16>
    %48 = arith.truncf %46 : vector<8x64xf32> to vector<8x64xbf16>
    %cst_23 = arith.constant dense<0.000000e+00> : vector<8x128xf32>
    %49 = tpu.matmul %48, %47, %cst_23 {dimension_numbers = #tpu.dot_dimension_numbers<[1], [0], [0], [1], [0, 0, 1, 1], [], []>} : vector<8x64xbf16>, vector<64x128xbf16>, vector<8x128xf32> -> vector<8x128xf32>
    %50 = vector.extract_strided_slice %49 {offsets = [0, 0], sizes = [8, 64], strides = [1, 1]} : vector<8x128xf32> to vector<8x64xf32>
    %c4 = arith.constant 4 : index
    %c0_24 = arith.constant 0 : index
    %51 = vector.load %arg5[%c4, %c0_24] : memref<16x256xf32, #tpu.memory_space<vmem>>, vector<1x64xf32>
    %52 = vector.broadcast %51 : vector<1x64xf32> to vector<8x64xf32>
    %53 = arith.addf %50, %52 : vector<8x64xf32>
    %c0_25 = arith.constant 0 : index
    %c128 = arith.constant 128 : index
    %54 = vector.load %arg4[%c0_25, %c128] : memref<64x640xbf16, #tpu.memory_space<vmem>>, vector<64x128xbf16>
    %55 = arith.truncf %53 : vector<8x64xf32> to vector<8x64xbf16>
    %cst_26 = arith.constant dense<0.000000e+00> : vector<8x128xf32>
    %56 = tpu.matmul %55, %54, %cst_26 {dimension_numbers = #tpu.dot_dimension_numbers<[1], [0], [0], [1], [0, 0, 1, 1], [], []>} : vector<8x64xbf16>, vector<64x128xbf16>, vector<8x128xf32> -> vector<8x128xf32>
    %57 = vector.extract_strided_slice %56 {offsets = [0, 0], sizes = [8, 16], strides = [1, 1]} : vector<8x128xf32> to vector<8x16xf32>
    %c5 = arith.constant 5 : index
    %c0_27 = arith.constant 0 : index
    %58 = vector.load %arg5[%c5, %c0_27] : memref<16x256xf32, #tpu.memory_space<vmem>>, vector<1x16xf32>
    %59 = vector.broadcast %58 : vector<1x16xf32> to vector<8x16xf32>
    %60 = arith.addf %57, %59 : vector<8x16xf32>
    %61 = vector.extract_strided_slice %60 {offsets = [0, 0], sizes = [8, 8], strides = [1, 1]} : vector<8x16xf32> to vector<8x8xf32>
    %62 = vector.extract_strided_slice %60 {offsets = [0, 8], sizes = [8, 8], strides = [1, 1]} : vector<8x16xf32> to vector<8x8xf32>
    %63 = math.exp %32 : vector<8x8xf32>
    %cst_28 = arith.constant 2.000000e-08 : f32
    %64 = vector.broadcast %cst_28 : f32 to vector<8x8xf32>
    %65 = arith.addf %63, %64 : vector<8x8xf32>
    %cst_29 = arith.constant 1.000000e+00 : f32
    %66 = vector.broadcast %cst_29 : f32 to vector<8x8xf32>
    %67 = arith.divf %66, %65 : vector<8x8xf32>
    %68 = math.exp %62 : vector<8x8xf32>
    %cst_30 = arith.constant 2.000000e-08 : f32
    %69 = vector.broadcast %cst_30 : f32 to vector<8x8xf32>
    %70 = arith.addf %68, %69 : vector<8x8xf32>
    %cst_31 = arith.constant 1.000000e+00 : f32
    %71 = vector.broadcast %cst_31 : f32 to vector<8x8xf32>
    %72 = arith.divf %71, %70 : vector<8x8xf32>
    %cst_32 = arith.constant 1.000000e+00 : f32
    %73 = vector.broadcast %cst_32 : f32 to vector<8x8xf32>
    %74 = arith.addf %73, %67 : vector<8x8xf32>
    %75 = arith.addf %74, %72 : vector<8x8xf32>
    %cst_33 = arith.constant 1.000000e+00 : f32
    %76 = vector.broadcast %cst_33 : f32 to vector<8x8xf32>
    %77 = arith.divf %76, %75 : vector<8x8xf32>
    %78 = arith.mulf %31, %67 : vector<8x8xf32>
    %79 = arith.mulf %61, %72 : vector<8x8xf32>
    %80 = arith.addf %78, %79 : vector<8x8xf32>
    %81 = arith.mulf %80, %77 : vector<8x8xf32>
    %cst_34 = arith.constant 9.99999993E-9 : f32
    %82 = vector.broadcast %cst_34 : f32 to vector<8x8xf32>
    %83 = arith.addf %77, %82 : vector<8x8xf32>
    %84 = math.log %83 : vector<8x8xf32>
    %c0_35 = arith.constant 0 : index
    %c2_36 = arith.constant 2 : index
    %85 = vector.load %arg1[%c0_35, %c2_36] : memref<8x128xf32, #tpu.memory_space<vmem>>, vector<8x8xf32>
    %cst_37 = arith.constant 5.000000e-01 : f32
    %86 = vector.broadcast %cst_37 : f32 to vector<8x8xf32>
    %87 = arith.mulf %86, %84 : vector<8x8xf32>
    %88 = math.exp %87 : vector<8x8xf32>
    %89 = arith.mulf %85, %88 : vector<8x8xf32>
    %90 = arith.addf %81, %89 : vector<8x8xf32>
    %cst_38 = arith.constant 0.000000e+00 : f32
    %91 = vector.broadcast %cst_38 : f32 to vector<8x56xf32>
    %92 = tpu.concatenate %90, %91 in 1 : vector<8x8xf32>, vector<8x56xf32> -> vector<8x64xf32>
    %c0_39 = arith.constant 0 : index
    %c256_40 = arith.constant 256 : index
    %93 = vector.load %arg4[%c0_39, %c256_40] : memref<64x640xbf16, #tpu.memory_space<vmem>>, vector<64x384xbf16>
    %94 = arith.truncf %92 : vector<8x64xf32> to vector<8x64xbf16>
    %cst_41 = arith.constant dense<0.000000e+00> : vector<8x384xf32>
    %95 = tpu.matmul %94, %93, %cst_41 {dimension_numbers = #tpu.dot_dimension_numbers<[1], [0], [0], [1], [0, 0, 1, 1], [], []>} : vector<8x64xbf16>, vector<64x384xbf16>, vector<8x384xf32> -> vector<8x384xf32>
    %96 = vector.extract_strided_slice %95 {offsets = [0, 0], sizes = [8, 256], strides = [1, 1]} : vector<8x384xf32> to vector<8x256xf32>
    %c6 = arith.constant 6 : index
    %c0_42 = arith.constant 0 : index
    %97 = vector.load %arg5[%c6, %c0_42] : memref<16x256xf32, #tpu.memory_space<vmem>>, vector<1x256xf32>
    %98 = vector.broadcast %97 : vector<1x256xf32> to vector<8x256xf32>
    %99 = arith.addf %96, %98 : vector<8x256xf32>
    %100 = arith.negf %99 : vector<8x256xf32>
    %101 = math.exp %100 : vector<8x256xf32>
    %cst_43 = arith.constant 1.000000e+00 : f32
    %102 = vector.broadcast %cst_43 : f32 to vector<8x256xf32>
    %103 = arith.addf %102, %101 : vector<8x256xf32>
    %104 = arith.divf %102, %103 : vector<8x256xf32>
    %105 = arith.mulf %99, %104 : vector<8x256xf32>
    %106 = vector.extract_strided_slice %95 {offsets = [0, 256], sizes = [8, 64], strides = [1, 1]} : vector<8x384xf32> to vector<8x64xf32>
    %c9 = arith.constant 9 : index
    %c0_44 = arith.constant 0 : index
    %107 = vector.load %arg5[%c9, %c0_44] : memref<16x256xf32, #tpu.memory_space<vmem>>, vector<1x64xf32>
    %108 = vector.broadcast %107 : vector<1x64xf32> to vector<8x64xf32>
    %109 = arith.addf %106, %108 : vector<8x64xf32>
    %c0_45 = arith.constant 0 : index
    %c0_46 = arith.constant 0 : index
    %110 = vector.load %arg4[%c0_45, %c0_46] : memref<64x640xbf16, #tpu.memory_space<vmem>>, vector<64x128xbf16>
    %111 = arith.truncf %109 : vector<8x64xf32> to vector<8x64xbf16>
    %cst_47 = arith.constant dense<0.000000e+00> : vector<8x128xf32>
    %112 = tpu.matmul %111, %110, %cst_47 {dimension_numbers = #tpu.dot_dimension_numbers<[1], [0], [0], [1], [0, 0, 1, 1], [], []>} : vector<8x64xbf16>, vector<64x128xbf16>, vector<8x128xf32> -> vector<8x128xf32>
    %113 = vector.extract_strided_slice %112 {offsets = [0, 64], sizes = [8, 64], strides = [1, 1]} : vector<8x128xf32> to vector<8x64xf32>
    %c10 = arith.constant 10 : index
    %c0_48 = arith.constant 0 : index
    %114 = vector.load %arg5[%c10, %c0_48] : memref<16x256xf32, #tpu.memory_space<vmem>>, vector<1x64xf32>
    %115 = vector.broadcast %114 : vector<1x64xf32> to vector<8x64xf32>
    %116 = arith.addf %113, %115 : vector<8x64xf32>
    %c0_49 = arith.constant 0 : index
    %c128_50 = arith.constant 128 : index
    %117 = vector.load %arg4[%c0_49, %c128_50] : memref<64x640xbf16, #tpu.memory_space<vmem>>, vector<64x128xbf16>
    %118 = arith.truncf %116 : vector<8x64xf32> to vector<8x64xbf16>
    %cst_51 = arith.constant dense<0.000000e+00> : vector<8x128xf32>
    %119 = tpu.matmul %118, %117, %cst_51 {dimension_numbers = #tpu.dot_dimension_numbers<[1], [0], [0], [1], [0, 0, 1, 1], [], []>} : vector<8x64xbf16>, vector<64x128xbf16>, vector<8x128xf32> -> vector<8x128xf32>
    %120 = vector.extract_strided_slice %119 {offsets = [0, 64], sizes = [8, 64], strides = [1, 1]} : vector<8x128xf32> to vector<8x64xf32>
    %c11 = arith.constant 11 : index
    %c0_52 = arith.constant 0 : index
    %121 = vector.load %arg5[%c11, %c0_52] : memref<16x256xf32, #tpu.memory_space<vmem>>, vector<1x64xf32>
    %122 = vector.broadcast %121 : vector<1x64xf32> to vector<8x64xf32>
    %123 = arith.addf %120, %122 : vector<8x64xf32>
    %c0_53 = arith.constant 0 : index
    %c256_54 = arith.constant 256 : index
    %124 = vector.load %arg4[%c0_53, %c256_54] : memref<64x640xbf16, #tpu.memory_space<vmem>>, vector<64x384xbf16>
    %125 = arith.truncf %123 : vector<8x64xf32> to vector<8x64xbf16>
    %cst_55 = arith.constant dense<0.000000e+00> : vector<8x384xf32>
    %126 = tpu.matmul %125, %124, %cst_55 {dimension_numbers = #tpu.dot_dimension_numbers<[1], [0], [0], [1], [0, 0, 1, 1], [], []>} : vector<8x64xbf16>, vector<64x384xbf16>, vector<8x384xf32> -> vector<8x384xf32>
    %127 = vector.extract_strided_slice %126 {offsets = [0, 320], sizes = [8, 5], strides = [1, 1]} : vector<8x384xf32> to vector<8x5xf32>
    %c12 = arith.constant 12 : index
    %c0_56 = arith.constant 0 : index
    %128 = vector.load %arg5[%c12, %c0_56] : memref<16x256xf32, #tpu.memory_space<vmem>>, vector<1x5xf32>
    %129 = vector.broadcast %128 : vector<1x5xf32> to vector<8x5xf32>
    %130 = arith.addf %127, %129 : vector<8x5xf32>
    %131 = vector.extract_strided_slice %126 {offsets = [0, 325], sizes = [8, 1], strides = [1, 1]} : vector<8x384xf32> to vector<8x1xf32>
    %c12_57 = arith.constant 12 : index
    %c8 = arith.constant 8 : index
    %132 = vector.load %arg5[%c12_57, %c8] : memref<16x256xf32, #tpu.memory_space<vmem>>, vector<1x1xf32>
    %133 = vector.broadcast %132 : vector<1x1xf32> to vector<8x1xf32>
    %134 = arith.addf %131, %133 : vector<8x1xf32>
    %cst_58 = arith.constant dense<0xFF800000> : vector<8xf32>
    %135 = vector.multi_reduction <maximumf>, %130, %cst_58 [1] : vector<8x5xf32> to vector<8xf32>
    %136 = vector.shape_cast %135 : vector<8xf32> to vector<8x1xf32>
    %137 = vector.broadcast %136 : vector<8x1xf32> to vector<8x5xf32>
    %138 = arith.subf %130, %137 : vector<8x5xf32>
    %139 = math.exp %138 : vector<8x5xf32>
    %cst_59 = arith.constant dense<0.000000e+00> : vector<8xf32>
    %140 = vector.multi_reduction <add>, %139, %cst_59 [1] : vector<8x5xf32> to vector<8xf32>
    %141 = vector.shape_cast %140 : vector<8xf32> to vector<8x1xf32>
    %142 = vector.broadcast %141 : vector<8x1xf32> to vector<8x5xf32>
    %143 = arith.divf %139, %142 : vector<8x5xf32>
    %c12_60 = arith.constant 12 : index
    %c16 = arith.constant 16 : index
    %144 = vector.load %arg5[%c12_60, %c16] : memref<16x256xf32, #tpu.memory_space<vmem>>, vector<1x5xf32>
    %145 = vector.broadcast %144 : vector<1x5xf32> to vector<8x5xf32>
    %146 = arith.mulf %143, %145 : vector<8x5xf32>
    %cst_61 = arith.constant dense<0.000000e+00> : vector<8xf32>
    %147 = vector.multi_reduction <add>, %146, %cst_61 [1] : vector<8x5xf32> to vector<8xf32>
    %148 = vector.shape_cast %147 : vector<8xf32> to vector<8x1xf32>
    %149 = math.cos %134 : vector<8x1xf32>
    %150 = arith.mulf %148, %149 : vector<8x1xf32>
    %151 = math.sin %134 : vector<8x1xf32>
    %152 = tpu.concatenate %150, %151 in 1 : vector<8x1xf32>, vector<8x1xf32> -> vector<8x2xf32>
    %153 = arith.negf %152 : vector<8x2xf32>
    %154 = math.exp %153 : vector<8x2xf32>
    %cst_62 = arith.constant 1.000000e+00 : f32
    %155 = vector.broadcast %cst_62 : f32 to vector<8x2xf32>
    %156 = arith.addf %155, %154 : vector<8x2xf32>
    %157 = arith.divf %155, %156 : vector<8x2xf32>
    %cst_63 = arith.constant 0.000000e+00 : f32
    %158 = vector.broadcast %cst_63 : f32 to vector<8x110xf32>
    %159 = tpu.concatenate %81, %84, %157, %158 in 1 : vector<8x8xf32>, vector<8x8xf32>, vector<8x2xf32>, vector<8x110xf32> -> vector<8x128xf32>
    %c0_64 = arith.constant 0 : index
    %c0_65 = arith.constant 0 : index
    %160 = vector.load %arg9[%c0_64, %c0_65] : memref<8x128xf32, #tpu.memory_space<vmem>>, vector<8x128xf32>
    tpu.vector_store %arg9[%c0_64, %c0_65], %159 {strides = array<i32>} : memref<8x128xf32, #tpu.memory_space<vmem>>, vector<8x128xf32>,
    tpu.wait_dma2 semaphore(%arg11 : memref<!tpu.dma_semaphore, #tpu.memory_space<semaphore_mem>>) src(%arg7 : memref<256x1536xbf16, #tpu.memory_space<any>>) dst(%arg10 : memref<256x1536xbf16, #tpu.memory_space<vmem>>)
    %c0_66 = arith.constant 0 : index
    %c0_67 = arith.constant 0 : index
    %161 = vector.load %arg10[%c0_66, %c0_67] : memref<256x1536xbf16, #tpu.memory_space<vmem>>, vector<256x256xbf16>
    %162 = arith.truncf %105 : vector<8x256xf32> to vector<8x256xbf16>
    %cst_68 = arith.constant dense<0.000000e+00> : vector<8x256xf32>
    %163 = tpu.matmul %162, %161, %cst_68 {dimension_numbers = #tpu.dot_dimension_numbers<[1], [0], [0], [1], [0, 0, 1, 1], [], []>} : vector<8x256xbf16>, vector<256x256xbf16>, vector<8x256xf32> -> vector<8x256xf32>
    %c7 = arith.constant 7 : index
    %c0_69 = arith.constant 0 : index
    %164 = vector.load %arg5[%c7, %c0_69] : memref<16x256xf32, #tpu.memory_space<vmem>>, vector<1x256xf32>
    %165 = vector.broadcast %164 : vector<1x256xf32> to vector<8x256xf32>
    %166 = arith.addf %163, %165 : vector<8x256xf32>
    %167 = arith.negf %166 : vector<8x256xf32>
    %168 = math.exp %167 : vector<8x256xf32>
    %cst_70 = arith.constant 1.000000e+00 : f32
    %169 = vector.broadcast %cst_70 : f32 to vector<8x256xf32>
    %170 = arith.addf %169, %168 : vector<8x256xf32>
    %171 = arith.divf %169, %170 : vector<8x256xf32>
    %172 = arith.mulf %166, %171 : vector<8x256xf32>
    %c0_71 = arith.constant 0 : index
    %c256_72 = arith.constant 256 : index
    %173 = vector.load %arg10[%c0_71, %c256_72] : memref<256x1536xbf16, #tpu.memory_space<vmem>>, vector<256x256xbf16>
    %174 = arith.truncf %172 : vector<8x256xf32> to vector<8x256xbf16>
    %cst_73 = arith.constant dense<0.000000e+00> : vector<8x256xf32>
    %175 = tpu.matmul %174, %173, %cst_73 {dimension_numbers = #tpu.dot_dimension_numbers<[1], [0], [0], [1], [0, 0, 1, 1], [], []>} : vector<8x256xbf16>, vector<256x256xbf16>, vector<8x256xf32> -> vector<8x256xf32>
    %c8_74 = arith.constant 8 : index
    %c0_75 = arith.constant 0 : index
    %176 = vector.load %arg5[%c8_74, %c0_75] : memref<16x256xf32, #tpu.memory_space<vmem>>, vector<1x256xf32>
    %177 = vector.broadcast %176 : vector<1x256xf32> to vector<8x256xf32>
    %178 = arith.addf %175, %177 : vector<8x256xf32>
    %179 = arith.negf %178 : vector<8x256xf32>
    %180 = math.exp %179 : vector<8x256xf32>
    %cst_76 = arith.constant 1.000000e+00 : f32
    %181 = vector.broadcast %cst_76 : f32 to vector<8x256xf32>
    %182 = arith.addf %181, %180 : vector<8x256xf32>
    %183 = arith.divf %181, %182 : vector<8x256xf32>
    %184 = arith.mulf %178, %183 : vector<8x256xf32>
    %c0_77 = arith.constant 0 : index
    %c512 = arith.constant 512 : index
    %185 = vector.load %arg10[%c0_77, %c512] : memref<256x1536xbf16, #tpu.memory_space<vmem>>, vector<256x1024xbf16>
    %186 = arith.truncf %184 : vector<8x256xf32> to vector<8x256xbf16>
    %cst_78 = arith.constant dense<0.000000e+00> : vector<8x1024xf32>
    %187 = tpu.matmul %186, %185, %cst_78 {dimension_numbers = #tpu.dot_dimension_numbers<[1], [0], [0], [1], [0, 0, 1, 1], [], []>} : vector<8x256xbf16>, vector<256x1024xbf16>, vector<8x1024xf32> -> vector<8x1024xf32>
    %c0_79 = arith.constant 0 : index
    %c0_80 = arith.constant 0 : index
    %188 = vector.load %arg6[%c0_79, %c0_80] : memref<1x1024xf32, #tpu.memory_space<vmem>>, vector<1x1024xf32>
    %189 = vector.broadcast %188 : vector<1x1024xf32> to vector<8x1024xf32>
    %190 = arith.addf %187, %189 : vector<8x1024xf32>
    %c0_81 = arith.constant 0 : index
    %c0_82 = arith.constant 0 : index
    %191 = vector.load %arg8[%c0_81, %c0_82] : memref<8x1024xf32, #tpu.memory_space<vmem>>, vector<8x1024xf32>
    tpu.vector_store %arg8[%c0_81, %c0_82], %190 {strides = array<i32>} : memref<8x1024xf32, #tpu.memory_space<vmem>>, vector<8x1024xf32>,
    return
  }
}

</mosaic_0001>

<bundles_post_ra>
// kernel: mvae_forward.1
= control target key start
LH: loop header
LB: loop body
LE: loop exit
PB: predicated region body
PF: predicated region fallthrough
CT: control target
= control target key end

     0   :  { %15 = vsyncpa [#allocation5], 0  ;;  %s4274_s0 = inlined_call_operand.vmem [shape: f32[8,1024], index: 0, kind: input, shape index: {}]   ;;  %s4275_s1 = inlined_call_operand.vmem [shape: f32[8,128], index: 1, kind: input, shape index: {}]   ;;  %s4276_s2 = inlined_call_operand.hbm [shape: bf16[1024,256], index: 2, kind: input, shape index: {}]   ;;  %s4277_s3 = inlined_call_operand.vmem [shape: bf16[256,384], index: 3, kind: input, shape index: {}]   ;;  %s4278_s4 = inlined_call_operand.vmem [shape: bf16[64,640], index: 4, kind: input, shape index: {}]   ;;  %s4279_s5 = inlined_call_operand.vmem [shape: f32[16,256], index: 5, kind: input, shape index: {}]   ;;  %s4280_s6 = inlined_call_operand.vmem [shape: f32[1,1024], index: 6, kind: input, shape index: {}]   ;;  %s4281_s7 = inlined_call_operand.hbm [shape: bf16[256,1536], index: 7, kind: input, shape index: {}]   ;;  %s4282_s8 = inlined_call_operand.hbm [shape: f32[8,1024], index: 8, kind: output, shape index: {0}]   ;;  %s4283_s9 = inlined_call_operand.vmem [shape: f32[8,128], index: 9, kind: output, shape index: {1}]  }
   0x1   :  { %16 = vsyncpa [#allocation6], 0  ;;  %s3704_s30 = smov [#allocation4]   ;;  %s3654_s13 = scalar_lea.hbm %s4276_s2, 16384 }
   0x2   :  { %s26_s10 = sshll.u32 %s3704_s30, 4  ;;  %p3655_p0 = scmp.ne.s32.totalorder %s4276_s2, %s3654_s13  ;;  %s27_s10 = int_to_ptr.vmem [resolvable:$true] %s26_s10 }
   0x3   :  { %p3658_p1 = scmp.lt.u32.totalorder %s3654_s13, %s4276_s2 }
   0x5   :  { %p3660_p2 = pnand %p3658_p1, %p3655_p0 }
   0x7   :  { %3663 = shalt.err (!%p3660_p2)
}
   0x8   :  { %s3664_s18 = scalar_lea.vmem %s27_s10, 16384  ;;  %p3669_p4 = scmp.lt.s32.totalorder %s27_s10, %s27_s10 }
   0x9   :  { %p3665_p3 = scmp.ne.s32.totalorder %s27_s10, %s3664_s18  ;;  %p3670_p5 = scmp.lt.s32.totalorder %s3664_s18, %s3664_s18 }
   0xb   :  { %p3671_p6 = por %p3670_p5, %p3669_p4 }
   0xd   :  { %p3672_p7 = pnand %p3671_p6, %p3665_p3 }
   0xf   :  { %3675 = shalt.err (!%p3672_p7)
}
  0x10   :  { %s3705_s19 = smov 128   ;;  %s3706_s20 = smov 8  }
  0x11   :  { %32 = dma.hbm_to_vmem [thread:$0]  %s4276_s2, 16384, %s27_s10, [#allocation5], %s3705_s19, %s3705_s19, %s3706_s20  }
  0x12   :  { %3698 = dma.done.wait [#allocation5], 16384  }
  0x13   :  { %3699 = vsyncadd [#allocation5], 4294950912  ;;  %s49_s23 = sld [smem:[#allocation0]]   ;;  %s3707_s24 = smov 1536   ;;  %vm3719_vm0 = vmmov 0   ;;  %vm1537_vm1 = vcmask 523264  }
  0x14   :  { %61 = sst [smem:[#allocation9]] %s3707_s24  ;;  %s3708_s25 = smov 12   ;;  %vm1707_vm2 = vcmask 64512   ;;  %vm2065_vm3 = vcmask 564736   ;;  %vm2076_vm4 = vcmask 39936  }
  0x15   :  { %63 = sst [smem:[#allocation9 + $0x1]] %s3707_s24  ;;  %s3709_s26 = smov 64  }
  0x16   :  { %65 = sst [smem:[#allocation9 + $0x2]] %s3708_s25  ;;  %s3710_s27 = smov 2  }
  0x17   :  { %67 = sst [smem:[#allocation9 + $0x3]] %s3709_s26  ;;  %s3711_s29 = smov 768  }
  0x18   :  { %69 = sst [smem:[#allocation9 + $0x4]] %s3705_s19  ;;  %s3712_s2 = smov 4  }
  0x19   :  { %71 = sst [smem:[#allocation9 + $0x5]] %s3710_s27  ;;  %s2904_s28 = sshll.u32 %s49_s23, 26 }
  0x1a   :  { %73 = sst [smem:[#allocation9 + $0x6]] %s3711_s29  ;;  %s2905_s30 = sadd.s32 134217728, %s2904_s28 }
  0x1b   :  { %75 = sst [smem:[#allocation9 + $0x7]] %s3709_s26  ;;  %s3713_s10 = smov [#allocation2]  }
  0x1c   :  { %77 = sst [smem:[#allocation9 + $0x8]] %s3712_s2  ;;  %s57_s11 = sshll.u32 %s3713_s10, 4  ;;  %s58_s11 = int_to_ptr.vmem [resolvable:$true] %s57_s11 }
  0x1d   :  { %s3714_s12 = smov [#allocation3]   ;;  %s3715_s13 = smov [#allocation8]  }
  0x1e   :  { %79 = dma.general %s4281_s7, 24576, %s58_s11, %s3714_s12, %s3715_s13, [#allocation9], %s2905_s30, 0  }
  0x1f   :  { %v3308_v0 = vld [vmem:[#allocation4 + $0x4] ss:$8 sps:$4 sm:$0xff]   ;;  %v3310_v1 = vld [vmem:[#allocation4] ss:$8 sps:$4 sm:$0xff]   ;;  %v3311_v2 = vld [vmem:[#allocation4 + $0x14] ss:$8 sps:$4 sm:$0xff]  }
  0x20   :  { %876 = vmatprep.subr.bf16.mxu0 %v3308_v0  ;;  %v3313_v3 = vld [vmem:[#allocation4 + $0x10] ss:$8 sps:$4 sm:$0xff]   ;;  %v3314_v4 = vld [vmem:[#allocation4 + $0x24] ss:$8 sps:$4 sm:$0xff]   ;;  %v3316_v5 = vld [vmem:[#allocation4 + $0x20] ss:$8 sps:$4 sm:$0xff]  }
  0x21   :  { %877 = vmatpush1.bf16.msra.mxu0 %v3310_v1  ;;  %v3317_v6 = vld [vmem:[#allocation4 + $0x34] ss:$8 sps:$4 sm:$0xff]   ;;  %v3319_v7 = vld [vmem:[#allocation4 + $0x30] ss:$8 sps:$4 sm:$0xff]   ;;  %v3320_v8 = vld [vmem:[#allocation4 + $0x44] ss:$8 sps:$4 sm:$0xff]  }
  0x22   :  { %878 = vmatprep.subr.bf16.mxu0 %v3311_v2  ;;  %v3322_v9 = vld [vmem:[#allocation4 + $0x40] ss:$8 sps:$4 sm:$0xff]   ;;  %v3323_v10 = vld [vmem:[#allocation4 + $0x54] ss:$8 sps:$4 sm:$0xff]   ;;  %v3325_v11 = vld [vmem:[#allocation4 + $0x50] ss:$8 sps:$4 sm:$0xff]  }
  0x23   :  { %v3326_v12 = vld [vmem:[#allocation4 + $0x64] ss:$8 sps:$4 sm:$0xff]   ;;  %v3328_v15 = vld [vmem:[#allocation4 + $0x60] ss:$8 sps:$4 sm:$0xff]   ;;  %v3329_v16 = vld [vmem:[#allocation4 + $0x74] ss:$8 sps:$4 sm:$0xff]  }
  0x24   :  { %v81_v13 = vld [vmem:[%s4274_s0 + $0x8] sm:$0xff]  ;;  %v3331_v17 = vld [vmem:[#allocation4 + $0x70] ss:$8 sps:$4 sm:$0xff]   ;;  %v3335_v20 = vld [vmem:[#allocation4 + $0x94] ss:$8 sps:$4 sm:$0xff]   ;;  %s3720_s20 = smov 120  }
  0x25   :  { %879 = vmatpush1.bf16.msra.mxu0 %v3313_v3  ;;  %v217_v14 = vpack.c.bf16 %v81_v13, %v81_v13  ;;  %v3332_v18 = vld [vmem:[#allocation4 + $0x84] ss:$8 sps:$4 sm:$0xff]   ;;  %v3334_v19 = vld [vmem:[#allocation4 + $0x80] ss:$8 sps:$4 sm:$0xff]   ;;  %v3337_v21 = vld [vmem:[#allocation4 + $0x90] ss:$8 sps:$4 sm:$0xff]  }
  0x26   :  { %880 = vmatprep.subr.bf16.mxu0 %v3314_v4  ;;  %v3338_v22 = vld [vmem:[#allocation4 + $0xa4] ss:$8 sps:$4 sm:$0xff]   ;;  %v3340_v23 = vld [vmem:[#allocation4 + $0xa0] ss:$8 sps:$4 sm:$0xff]   ;;  %v3341_v24 = vld [vmem:[#allocation4 + $0xb4] ss:$8 sps:$4 sm:$0xff]  }
  0x27   :  { %908 = vmatprep.mubr.bf16.mxu0 %v217_v14  ;;  %v3343_v25 = vld [vmem:[#allocation4 + $0xb0] ss:$8 sps:$4 sm:$0xff]   ;;  %v3344_v26 = vld [vmem:[#allocation4 + $0xc4] ss:$8 sps:$4 sm:$0xff]   ;;  %v3346_v27 = vld [vmem:[#allocation4 + $0xc0] ss:$8 sps:$4 sm:$0xff]  }
  0x28   :  { %v3347_v28 = vld [vmem:[#allocation4 + $0xd4] ss:$8 sps:$4 sm:$0xff]   ;;  %v3349_v29 = vld [vmem:[#allocation4 + $0xd0] ss:$8 sps:$4 sm:$0xff]   ;;  %v3350_v30 = vld [vmem:[#allocation4 + $0xe4] ss:$8 sps:$4 sm:$0xff]  }
  0x29   :  { %881 = vmatpush1.bf16.msra.mxu0 %v3316_v5  ;;  %v3352_v31 = vld [vmem:[#allocation4 + $0xe0] ss:$8 sps:$4 sm:$0xff]   ;;  %v3353_v32 = vld [vmem:[#allocation4 + $0xf4] ss:$8 sps:$4 sm:$0xff]   ;;  %v3355_v33 = vld [vmem:[#allocation4 + $0xf0] ss:$8 sps:$4 sm:$0xff]  }
  0x2a   :  { %882 = vmatprep.subr.bf16.mxu0 %v3317_v6  ;;  %v3358_v34 = vld [vmem:[#allocation4 + $0x104] ss:$8 sps:$4 sm:$0xff]   ;;  %v83_v36 = vld [vmem:[%s4274_s0 + $0x18] sm:$0xff]  ;;  %v3356_v38 = vld [vmem:[#allocation4 + $0x100] ss:$8 sps:$4 sm:$0xff]   ;;  %s3721_s27 = smov 122  }
  0x2b   :  { %v80_v35 = vld [vmem:[%s4274_s0] sm:$0xff]  ;;  %v219_v39 = vpack.c.bf16 %v83_v36, %v83_v36  ;;  %v3361_v40 = vld [vmem:[#allocation4 + $0x114] ss:$8 sps:$4 sm:$0xff]   ;;  %v3359_v41 = vld [vmem:[#allocation4 + $0x110] ss:$8 sps:$4 sm:$0xff]   ;;  %s3722_s15 = smov 126  }
  0x2c   :  { %v216_v37 = vpack.c.bf16 %v80_v35, %v80_v35  ;;  %v3364_v42 = vld [vmem:[#allocation4 + $0x124] ss:$8 sps:$4 sm:$0xff]   ;;  %v3362_v43 = vld [vmem:[#allocation4 + $0x120] ss:$8 sps:$4 sm:$0xff]   ;;  %v3367_v44 = vld [vmem:[#allocation4 + $0x134] ss:$8 sps:$4 sm:$0xff]  }
  0x2d   :  { %883 = vmatpush1.bf16.msra.mxu0 %v3319_v7  ;;  %v3365_v45 = vld [vmem:[#allocation4 + $0x130] ss:$8 sps:$4 sm:$0xff]   ;;  %v3370_v46 = vld [vmem:[#allocation4 + $0x144] ss:$8 sps:$4 sm:$0xff]   ;;  %v3368_v47 = vld [vmem:[#allocation4 + $0x140] ss:$8 sps:$4 sm:$0xff]  }
  0x2e   :  { %884 = vmatprep.subr.bf16.mxu0 %v3320_v8  ;;  %v3373_v48 = vld [vmem:[#allocation4 + $0x154] ss:$8 sps:$4 sm:$0xff]   ;;  %v3371_v49 = vld [vmem:[#allocation4 + $0x150] ss:$8 sps:$4 sm:$0xff]   ;;  %v3376_v50 = vld [vmem:[#allocation4 + $0x164] ss:$8 sps:$4 sm:$0xff]  }
  0x2f   :  { %v3374_v51 = vld [vmem:[#allocation4 + $0x160] ss:$8 sps:$4 sm:$0xff]   ;;  %v3379_v52 = vld [vmem:[#allocation4 + $0x174] ss:$8 sps:$4 sm:$0xff]   ;;  %v3377_v53 = vld [vmem:[#allocation4 + $0x170] ss:$8 sps:$4 sm:$0xff]  }
  0x30   :  { %v3382_v54 = vld [vmem:[#allocation4 + $0x184] ss:$8 sps:$4 sm:$0xff]   ;;  %v3380_v55 = vld [vmem:[#allocation4 + $0x180] ss:$8 sps:$4 sm:$0xff]   ;;  %v3385_v56 = vld [vmem:[#allocation4 + $0x194] ss:$8 sps:$4 sm:$0xff]  }
  0x31   :  { %885 = vmatpush1.bf16.msra.mxu0 %v3322_v9  ;;  %v3383_v57 = vld [vmem:[#allocation4 + $0x190] ss:$8 sps:$4 sm:$0xff]   ;;  %v3388_v58 = vld [vmem:[#allocation4 + $0x1a4] ss:$8 sps:$4 sm:$0xff]   ;;  %v3386_v59 = vld [vmem:[#allocation4 + $0x1a0] ss:$8 sps:$4 sm:$0xff]  }
  0x32   :  { %886 = vmatprep.subr.bf16.mxu0 %v3323_v10  ;;  %v3391_v60 = vld [vmem:[#allocation4 + $0x1b4] ss:$8 sps:$4 sm:$0xff]   ;;  %v3389_v61 = vld [vmem:[#allocation4 + $0x1b0] ss:$8 sps:$4 sm:$0xff]   ;;  %v3394_v62 = vld [vmem:[#allocation4 + $0x1c4] ss:$8 sps:$4 sm:$0xff]  }
  0x33   :  { %v3392_v63 = vld [vmem:[#allocation4 + $0x1c0] ss:$8 sps:$4 sm:$0xff]   ;;  %v3397_v0 = vld [vmem:[#allocation4 + $0x1d4] ss:$8 sps:$4 sm:$0xff]   ;;  %v3395_v1 = vld [vmem:[#allocation4 + $0x1d0] ss:$8 sps:$4 sm:$0xff]  }
  0x34   :  { %v3400_v2 = vld [vmem:[#allocation4 + $0x1e4] ss:$8 sps:$4 sm:$0xff]   ;;  %v3398_v3 = vld [vmem:[#allocation4 + $0x1e0] ss:$8 sps:$4 sm:$0xff]   ;;  %v3403_v4 = vld [vmem:[#allocation4 + $0x1f4] ss:$8 sps:$4 sm:$0xff]  }
  0x35   :  { %887 = vmatpush1.bf16.msra.mxu0 %v3325_v11  ;;  %v3401_v5 = vld [vmem:[#allocation4 + $0x1f0] ss:$8 sps:$4 sm:$0xff]   ;;  %v3406_v7 = vld [vmem:[#allocation4 + $0x204] ss:$8 sps:$4 sm:$0xff]   ;;  %v3404_v10 = vld [vmem:[#allocation4 + $0x200] ss:$8 sps:$4 sm:$0xff]  }
  0x36   :  { %888 = vmatprep.subr.bf16.mxu0 %v3326_v12  ;;  %v82_v6 = vld [vmem:[%s4274_s0 + $0x10] sm:$0xff]  ;;  %v85_v8 = vld [vmem:[%s4274_s0 + $0x28] sm:$0xff]  ;;  %s3723_s2 = smov 48   ;;  %s3732_s10 = smov 60  }
  0x37   :  { %v218_v9 = vpack.c.bf16 %v82_v6, %v82_v6  ;;  %v221_v11 = vpack.c.bf16 %v85_v8, %v85_v8  ;;  %v3409_v12 = vld [vmem:[#allocation4 + $0x214] ss:$8 sps:$4 sm:$0xff]   ;;  %v3500_v13 = vld [vmem:[%s4277_s3 + $0x4] ss:$12 sps:$4 sm:$0xff]   ;;  %v3502_v14 = vld [vmem:[%s4277_s3] ss:$12 sps:$4 sm:$0xff]  }
  0x38   :  { %1261 = vmatprep.subr.bf16.mxu1 %v3500_v13  ;;  %v3518_v35 = vld [vmem:[%s4277_s3 + $0x94] ss:$12 sps:$4 sm:$0xff]   ;;  %v3467_v8 = vld [vmem:[#allocation4 + $0x350] ss:$8 sps:$4 sm:$0xff]   ;;  %v3478_v13 = vld [vmem:[#allocation4 + $0x384] ss:$8 sps:$4 sm:$0xff]  }
  0x39   :  { %889 = vmatpush1.bf16.msra.mxu0 %v3328_v15  ;;  %v3503_v15 = vld [vmem:[%s4277_s3 + $0x1c] ss:$12 sps:$4 sm:$0xff]   ;;  %1262 = vmatpush1.bf16.msra.mxu1 %v3502_v14  ;;  %s3733_s11 = smov 16  }
  0x3a   :  { %890 = vmatprep.subr.bf16.mxu0 %v3329_v16  ;;  %v3407_v16 = vld [vmem:[#allocation4 + $0x210] ss:$8 sps:$4 sm:$0xff]   ;;  %1263 = vmatprep.subr.bf16.mxu1 %v3503_v15  ;;  %v3422_v36 = vld [vmem:[#allocation4 + $0x260] ss:$8 sps:$4 sm:$0xff]   ;;  %v3481_v15 = vld [vmem:[#allocation4 + $0x394] ss:$8 sps:$4 sm:$0xff]  }
  0x3b   :  { %v3464_v6 = vld [vmem:[#allocation4 + $0x340] ss:$8 sps:$4 sm:$0xff]  }
  0x3c   :  { %v3476_v14 = vld [vmem:[#allocation4 + $0x380] ss:$8 sps:$4 sm:$0xff]  }
  0x3d   :  { %891 = vmatpush1.bf16.msra.mxu0 %v3331_v17  ;;  %v3412_v17 = vld [vmem:[#allocation4 + $0x224] ss:$8 sps:$4 sm:$0xff]  }
  0x3e   :  { %892 = vmatprep.subr.bf16.mxu0 %v3332_v18  ;;  %v3505_v18 = vld [vmem:[%s4277_s3 + $0x18] ss:$12 sps:$4 sm:$0xff]  }
  0x3f   :  { %1264 = vmatpush1.bf16.msra.mxu1 %v3505_v18  ;;  %v3482_v18 = vld [vmem:[#allocation4 + $0x3a0] ss:$8 sps:$4 sm:$0xff]  }
  0x41   :  { %893 = vmatpush1.bf16.msra.mxu0 %v3334_v19  ;;  %v3506_v19 = vld [vmem:[%s4277_s3 + $0x34] ss:$12 sps:$4 sm:$0xff]  }
  0x42   :  { %894 = vmatprep.subr.bf16.mxu0 %v3335_v20  ;;  %v3410_v20 = vld [vmem:[#allocation4 + $0x220] ss:$8 sps:$4 sm:$0xff]   ;;  %1265 = vmatprep.subr.bf16.mxu1 %v3506_v19  ;;  %v3487_v19 = vld [vmem:[#allocation4 + $0x3b4] ss:$8 sps:$4 sm:$0xff]  }
  0x45   :  { %895 = vmatpush1.bf16.msra.mxu0 %v3337_v21  ;;  %v3415_v21 = vld [vmem:[#allocation4 + $0x234] ss:$8 sps:$4 sm:$0xff]  }
  0x46   :  { %896 = vmatprep.subr.bf16.mxu0 %v3338_v22  ;;  %v3508_v22 = vld [vmem:[%s4277_s3 + $0x30] ss:$12 sps:$4 sm:$0xff]  }
  0x47   :  { %1266 = vmatpush1.bf16.msra.mxu1 %v3508_v22  ;;  %v3488_v22 = vld [vmem:[#allocation4 + $0x3c0] ss:$8 sps:$4 sm:$0xff]  }
  0x49   :  { %897 = vmatpush1.bf16.msra.mxu0 %v3340_v23  ;;  %v3509_v23 = vld [vmem:[%s4277_s3 + $0x4c] ss:$12 sps:$4 sm:$0xff]  }
  0x4a   :  { %898 = vmatprep.subr.bf16.mxu0 %v3341_v24  ;;  %v3413_v24 = vld [vmem:[#allocation4 + $0x230] ss:$8 sps:$4 sm:$0xff]   ;;  %1267 = vmatprep.subr.bf16.mxu1 %v3509_v23  ;;  %v3493_v23 = vld [vmem:[#allocation4 + $0x3d4] ss:$8 sps:$4 sm:$0xff]  }
  0x4d   :  { %899 = vmatpush1.bf16.msra.mxu0 %v3343_v25  ;;  %v3418_v25 = vld [vmem:[#allocation4 + $0x244] ss:$8 sps:$4 sm:$0xff]  }
  0x4e   :  { %900 = vmatprep.subr.bf16.mxu0 %v3344_v26  ;;  %v3511_v26 = vld [vmem:[%s4277_s3 + $0x48] ss:$12 sps:$4 sm:$0xff]  }
  0x4f   :  { %1268 = vmatpush1.bf16.msra.mxu1 %v3511_v26  ;;  %v3494_v26 = vld [vmem:[#allocation4 + $0x3e0] ss:$8 sps:$4 sm:$0xff]  }
  0x51   :  { %901 = vmatpush1.bf16.msra.mxu0 %v3346_v27  ;;  %v3512_v27 = vld [vmem:[%s4277_s3 + $0x64] ss:$12 sps:$4 sm:$0xff]  }
  0x52   :  { %902 = vmatprep.subr.bf16.mxu0 %v3347_v28  ;;  %v3416_v28 = vld [vmem:[#allocation4 + $0x240] ss:$8 sps:$4 sm:$0xff]   ;;  %1269 = vmatprep.subr.bf16.mxu1 %v3512_v27  ;;  %v3499_v27 = vld [vmem:[#allocation4 + $0x3f4] ss:$8 sps:$4 sm:$0xff]  }
  0x55   :  { %903 = vmatpush1.bf16.msra.mxu0 %v3349_v29  ;;  %v3421_v29 = vld [vmem:[#allocation4 + $0x254] ss:$8 sps:$4 sm:$0xff]  }
  0x56   :  { %904 = vmatprep.subr.bf16.mxu0 %v3350_v30  ;;  %v3514_v30 = vld [vmem:[%s4277_s3 + $0x60] ss:$12 sps:$4 sm:$0xff]  }
  0x57   :  { %1270 = vmatpush1.bf16.msra.mxu1 %v3514_v30 }
  0x59   :  { %905 = vmatpush1.bf16.msra.mxu0 %v3352_v31  ;;  %v3515_v31 = vld [vmem:[%s4277_s3 + $0x7c] ss:$12 sps:$4 sm:$0xff]  }
  0x5a   :  { %906 = vmatprep.subr.bf16.mxu0 %v3353_v32  ;;  %v3419_v32 = vld [vmem:[#allocation4 + $0x250] ss:$8 sps:$4 sm:$0xff]   ;;  %1271 = vmatprep.subr.bf16.mxu1 %v3515_v31  ;;  %v3523_v31 = vld [vmem:[%s4277_s3 + $0xa8] ss:$12 sps:$4 sm:$0xff]  }
  0x5d   :  { %907 = vmatpush1.bf16.msra.mxu0 %v3355_v33  ;;  %v3424_v33 = vld [vmem:[#allocation4 + $0x264] ss:$8 sps:$4 sm:$0xff]  }
  0x5e   :  { %917 = vmatprep.subr.bf16.mxu0 %v3358_v34  ;;  %v3517_v34 = vld [vmem:[%s4277_s3 + $0x78] ss:$12 sps:$4 sm:$0xff]  }
  0x5f   :  { %1272 = vmatpush1.bf16.msra.mxu1 %v3517_v34  ;;  %v3527_v34 = vld [vmem:[%s4277_s3 + $0xdc] ss:$12 sps:$4 sm:$0xff]  }
  0x60   :  { %909 = vmatmul.mubr.bf16.vlgmr.msra.gmra.mrb[0].mxu0 %v216_v37  ;;  %v3427_v37 = vld [vmem:[#allocation4 + $0x274] ss:$8 sps:$4 sm:$0xff]   ;;  %1273 = vmatprep.subr.bf16.mxu1 %v3518_v35  ;;  %v3529_v35 = vld [vmem:[%s4277_s3 + $0xd8] ss:$12 sps:$4 sm:$0xff]  }
  0x61   :  { %918 = vmatpush1.bf16.msra.mxu0 %v3356_v38  ;;  %949 = vmatprep.mubr.bf16.mxu0 %v219_v39  ;;  %v3520_v38 = vld [vmem:[%s4277_s3 + $0x90] ss:$12 sps:$4 sm:$0xff]   ;;  %v3521_v39 = vld [vmem:[%s4277_s3 + $0xac] ss:$12 sps:$4 sm:$0xff]  }
  0x62   :  { %919 = vmatprep.subr.bf16.mxu0 %v3361_v40  ;;  %v3425_v40 = vld [vmem:[#allocation4 + $0x270] ss:$8 sps:$4 sm:$0xff]  }
  0x63   :  { %1274 = vmatpush1.bf16.msra.mxu1 %v3520_v38  ;;  %v3533_v38 = vld [vmem:[%s4277_s3 + $0x10c] ss:$12 sps:$4 sm:$0xff]  }
  0x64   :  { %1275 = vmatprep.subr.bf16.mxu1 %v3521_v39  ;;  %v3535_v39 = vld [vmem:[%s4277_s3 + $0x108] ss:$12 sps:$4 sm:$0xff]  }
  0x65   :  { %920 = vmatpush1.bf16.msra.mxu0 %v3359_v41  ;;  %v3430_v41 = vld [vmem:[#allocation4 + $0x284] ss:$8 sps:$4 sm:$0xff]  }
  0x66   :  { %921 = vmatprep.subr.bf16.mxu0 %v3364_v42  ;;  %v3428_v42 = vld [vmem:[#allocation4 + $0x280] ss:$8 sps:$4 sm:$0xff]  }
  0x67   :  { %1276 = vmatpush1.bf16.msra.mxu1 %v3523_v31 }
  0x69   :  { %922 = vmatpush1.bf16.msra.mxu0 %v3362_v43  ;;  %v3433_v43 = vld [vmem:[#allocation4 + $0x294] ss:$8 sps:$4 sm:$0xff]  }
  0x6a   :  { %923 = vmatprep.subr.bf16.mxu0 %v3367_v44  ;;  %v3431_v44 = vld [vmem:[#allocation4 + $0x290] ss:$8 sps:$4 sm:$0xff]  }
  0x6d   :  { %924 = vmatpush1.bf16.msra.mxu0 %v3365_v45  ;;  %v3436_v45 = vld [vmem:[#allocation4 + $0x2a4] ss:$8 sps:$4 sm:$0xff]  }
  0x6e   :  { %925 = vmatprep.subr.bf16.mxu0 %v3370_v46  ;;  %v3434_v46 = vld [vmem:[#allocation4 + $0x2a0] ss:$8 sps:$4 sm:$0xff]  }
  0x71   :  { %926 = vmatpush1.bf16.msra.mxu0 %v3368_v47  ;;  %v3439_v47 = vld [vmem:[#allocation4 + $0x2b4] ss:$8 sps:$4 sm:$0xff]  }
  0x72   :  { %927 = vmatprep.subr.bf16.mxu0 %v3373_v48  ;;  %v3437_v48 = vld [vmem:[#allocation4 + $0x2b0] ss:$8 sps:$4 sm:$0xff]  }
  0x75   :  { %928 = vmatpush1.bf16.msra.mxu0 %v3371_v49  ;;  %v3442_v49 = vld [vmem:[#allocation4 + $0x2c4] ss:$8 sps:$4 sm:$0xff]  }
  0x76   :  { %929 = vmatprep.subr.bf16.mxu0 %v3376_v50  ;;  %v3440_v50 = vld [vmem:[#allocation4 + $0x2c0] ss:$8 sps:$4 sm:$0xff]  }
  0x79   :  { %930 = vmatpush1.bf16.msra.mxu0 %v3374_v51  ;;  %v3445_v51 = vld [vmem:[#allocation4 + $0x2d4] ss:$8 sps:$4 sm:$0xff]  }
  0x7a   :  { %931 = vmatprep.subr.bf16.mxu0 %v3379_v52  ;;  %v3443_v52 = vld [vmem:[#allocation4 + $0x2d0] ss:$8 sps:$4 sm:$0xff]  }
  0x7d   :  { %932 = vmatpush1.bf16.msra.mxu0 %v3377_v53  ;;  %v3448_v53 = vld [vmem:[#allocation4 + $0x2e4] ss:$8 sps:$4 sm:$0xff]  }
  0x7e   :  { %933 = vmatprep.subr.bf16.mxu0 %v3382_v54  ;;  %v3446_v54 = vld [vmem:[#allocation4 + $0x2e0] ss:$8 sps:$4 sm:$0xff]  }
  0x81   :  { %934 = vmatpush1.bf16.msra.mxu0 %v3380_v55  ;;  %v3451_v55 = vld [vmem:[#allocation4 + $0x2f4] ss:$8 sps:$4 sm:$0xff]  }
  0x82   :  { %935 = vmatprep.subr.bf16.mxu0 %v3385_v56  ;;  %v3449_v56 = vld [vmem:[#allocation4 + $0x2f0] ss:$8 sps:$4 sm:$0xff]  }
  0x85   :  { %936 = vmatpush1.bf16.msra.mxu0 %v3383_v57  ;;  %v84_v57 = vld [vmem:[%s4274_s0 + $0x20] sm:$0xff] }
  0x86   :  { %937 = vmatprep.subr.bf16.mxu0 %v3388_v58  ;;  %v3454_v58 = vld [vmem:[#allocation4 + $0x304] ss:$8 sps:$4 sm:$0xff]  }
  0x89   :  { %938 = vmatpush1.bf16.msra.mxu0 %v3386_v59  ;;  %v87_v59 = vld [vmem:[%s4274_s0 + $0x38] sm:$0xff] }
  0x8a   :  { %939 = vmatprep.subr.bf16.mxu0 %v3391_v60  ;;  %v220_v60 = vpack.c.bf16 %v84_v57, %v84_v57 }
  0x8d   :  { %940 = vmatpush1.bf16.msra.mxu0 %v3389_v61  ;;  %v3452_v61 = vld [vmem:[#allocation4 + $0x300] ss:$8 sps:$4 sm:$0xff]  }
  0x8e   :  { %941 = vmatprep.subr.bf16.mxu0 %v3394_v62  ;;  %v223_v62 = vpack.c.bf16 %v87_v59, %v87_v59 }
  0x91   :  { %942 = vmatpush1.bf16.msra.mxu0 %v3392_v63  ;;  %v3457_v63 = vld [vmem:[#allocation4 + $0x314] ss:$8 sps:$4 sm:$0xff]  }
  0x92   :  { %943 = vmatprep.subr.bf16.mxu0 %v3397_v0  ;;  %v3455_v0 = vld [vmem:[#allocation4 + $0x310] ss:$8 sps:$4 sm:$0xff]  }
  0x95   :  { %944 = vmatpush1.bf16.msra.mxu0 %v3395_v1  ;;  %v3460_v1 = vld [vmem:[#allocation4 + $0x324] ss:$8 sps:$4 sm:$0xff]  }
  0x96   :  { %945 = vmatprep.subr.bf16.mxu0 %v3400_v2  ;;  %v3458_v2 = vld [vmem:[#allocation4 + $0x320] ss:$8 sps:$4 sm:$0xff]  }
  0x99   :  { %946 = vmatpush1.bf16.msra.mxu0 %v3398_v3  ;;  %v3463_v3 = vld [vmem:[#allocation4 + $0x334] ss:$8 sps:$4 sm:$0xff]  }
  0x9a   :  { %947 = vmatprep.subr.bf16.mxu0 %v3403_v4  ;;  %v3461_v4 = vld [vmem:[#allocation4 + $0x330] ss:$8 sps:$4 sm:$0xff]  }
  0x9d   :  { %948 = vmatpush1.bf16.msra.mxu0 %v3401_v5  ;;  %v3466_v5 = vld [vmem:[#allocation4 + $0x344] ss:$8 sps:$4 sm:$0xff]  }
  0x9e   :  { %958 = vmatprep.subr.bf16.mxu0 %v3406_v7  ;;  %v3469_v7 = vld [vmem:[#allocation4 + $0x354] ss:$8 sps:$4 sm:$0xff]  }
  0xa0   :  { %950 = vmatmul.mubr.bf16.vlgmr.msra.gmra.mrb[0].mxu0 %v218_v9  ;;  %v3472_v9 = vld [vmem:[#allocation4 + $0x364] ss:$8 sps:$4 sm:$0xff]  }
  0xa1   :  { %959 = vmatpush1.bf16.msra.mxu0 %v3404_v10  ;;  %990 = vmatprep.mubr.bf16.mxu0 %v221_v11  ;;  %v3470_v10 = vld [vmem:[#allocation4 + $0x360] ss:$8 sps:$4 sm:$0xff]   ;;  %v3475_v11 = vld [vmem:[#allocation4 + $0x374] ss:$8 sps:$4 sm:$0xff]  }
  0xa2   :  { %960 = vmatprep.subr.bf16.mxu0 %v3409_v12  ;;  %v3473_v12 = vld [vmem:[#allocation4 + $0x370] ss:$8 sps:$4 sm:$0xff]  }
  0xa5   :  { %961 = vmatpush1.bf16.msra.mxu0 %v3407_v16  ;;  %v3479_v16 = vld [vmem:[#allocation4 + $0x390] ss:$8 sps:$4 sm:$0xff]  }
  0xa6   :  { %962 = vmatprep.subr.bf16.mxu0 %v3412_v17  ;;  %v3484_v17 = vld [vmem:[#allocation4 + $0x3a4] ss:$8 sps:$4 sm:$0xff]  }
  0xa9   :  { %963 = vmatpush1.bf16.msra.mxu0 %v3410_v20  ;;  %v3485_v20 = vld [vmem:[#allocation4 + $0x3b0] ss:$8 sps:$4 sm:$0xff]  }
  0xaa   :  { %964 = vmatprep.subr.bf16.mxu0 %v3415_v21  ;;  %v3490_v21 = vld [vmem:[#allocation4 + $0x3c4] ss:$8 sps:$4 sm:$0xff]  }
  0xad   :  { %965 = vmatpush1.bf16.msra.mxu0 %v3413_v24  ;;  %v3491_v24 = vld [vmem:[#allocation4 + $0x3d0] ss:$8 sps:$4 sm:$0xff]  }
  0xae   :  { %966 = vmatprep.subr.bf16.mxu0 %v3418_v25  ;;  %v3496_v25 = vld [vmem:[#allocation4 + $0x3e4] ss:$8 sps:$4 sm:$0xff]  }
  0xb1   :  { %967 = vmatpush1.bf16.msra.mxu0 %v3416_v28  ;;  %v3497_v28 = vld [vmem:[#allocation4 + $0x3f0] ss:$8 sps:$4 sm:$0xff]  }
  0xb2   :  { %968 = vmatprep.subr.bf16.mxu0 %v3421_v29  ;;  %v86_v29 = vld [vmem:[%s4274_s0 + $0x30] sm:$0xff] }
  0xb3   :  { %v222_v30 = vpack.c.bf16 %v86_v29, %v86_v29  ;;  %v3036_v29 = vld [vmem:[%s4279_s5 + $0x1] ss:$8 sm:$0x3] }
  0xb5   :  { %969 = vmatpush1.bf16.msra.mxu0 %v3419_v32  ;;  %v3524_v32 = vld [vmem:[%s4277_s3 + $0xc4] ss:$12 sps:$4 sm:$0xff]  }
  0xb6   :  { %970 = vmatprep.subr.bf16.mxu0 %v3424_v33  ;;  %v3526_v33 = vld [vmem:[%s4277_s3 + $0xc0] ss:$12 sps:$4 sm:$0xff]   ;;  %1277 = vmatprep.subr.bf16.mxu1 %v3524_v32 }
  0xb7   :  { %1278 = vmatpush1.bf16.msra.mxu1 %v3526_v33 }
  0xb8   :  { %1279 = vmatprep.subr.bf16.mxu1 %v3527_v34 }
  0xb9   :  { %971 = vmatpush1.bf16.msra.mxu0 %v3422_v36  ;;  %v3530_v36 = vld [vmem:[%s4277_s3 + $0xf4] ss:$12 sps:$4 sm:$0xff]  }
  0xba   :  { %972 = vmatprep.subr.bf16.mxu0 %v3427_v37  ;;  %v3532_v37 = vld [vmem:[%s4277_s3 + $0xf0] ss:$12 sps:$4 sm:$0xff]  }
  0xbb   :  { %1280 = vmatpush1.bf16.msra.mxu1 %v3529_v35 }
  0xbc   :  { %1281 = vmatprep.subr.bf16.mxu1 %v3530_v36 }
  0xbd   :  { %973 = vmatpush1.bf16.msra.mxu0 %v3425_v40  ;;  %v3536_v40 = vld [vmem:[%s4277_s3 + $0x124] ss:$12 sps:$4 sm:$0xff]  }
  0xbe   :  { %974 = vmatprep.subr.bf16.mxu0 %v3430_v41  ;;  %v3538_v41 = vld [vmem:[%s4277_s3 + $0x120] ss:$12 sps:$4 sm:$0xff]  }
  0xbf   :  { %1282 = vmatpush1.bf16.msra.mxu1 %v3532_v37 }
  0xc0   :  { %1283 = vmatprep.subr.bf16.mxu1 %v3533_v38 }
  0xc1   :  { %975 = vmatpush1.bf16.msra.mxu0 %v3428_v42  ;;  %v3539_v42 = vld [vmem:[%s4277_s3 + $0x13c] ss:$12 sps:$4 sm:$0xff]  }
  0xc2   :  { %976 = vmatprep.subr.bf16.mxu0 %v3433_v43  ;;  %v3541_v43 = vld [vmem:[%s4277_s3 + $0x138] ss:$12 sps:$4 sm:$0xff]  }
  0xc3   :  { %1284 = vmatpush1.bf16.msra.mxu1 %v3535_v39 }
  0xc4   :  { %1285 = vmatprep.subr.bf16.mxu1 %v3536_v40 }
  0xc5   :  { %977 = vmatpush1.bf16.msra.mxu0 %v3431_v44  ;;  %v3542_v44 = vld [vmem:[%s4277_s3 + $0x154] ss:$12 sps:$4 sm:$0xff]  }
  0xc6   :  { %978 = vmatprep.subr.bf16.mxu0 %v3436_v45  ;;  %v3544_v45 = vld [vmem:[%s4277_s3 + $0x150] ss:$12 sps:$4 sm:$0xff]  }
  0xc7   :  { %1286 = vmatpush1.bf16.msra.mxu1 %v3538_v41 }
  0xc8   :  { %1287 = vmatprep.subr.bf16.mxu1 %v3539_v42 }
  0xc9   :  { %979 = vmatpush1.bf16.msra.mxu0 %v3434_v46  ;;  %v3545_v46 = vld [vmem:[%s4277_s3 + $0x16c] ss:$12 sps:$4 sm:$0xff]  }
  0xca   :  { %980 = vmatprep.subr.bf16.mxu0 %v3439_v47  ;;  %v3547_v47 = vld [vmem:[%s4277_s3 + $0x168] ss:$12 sps:$4 sm:$0xff]  }
  0xcb   :  { %1288 = vmatpush1.bf16.msra.mxu1 %v3541_v43 }
  0xcc   :  { %1289 = vmatprep.subr.bf16.mxu1 %v3542_v44 }
  0xcd   :  { %981 = vmatpush1.bf16.msra.mxu0 %v3437_v48  ;;  %v3925_v48 = vld [vmem:[%s4275_s1] sm:$0xff]  ;;  %s3724_s1 = smov 61  }
  0xce   :  { %982 = vmatprep.subr.bf16.mxu0 %v3442_v49  ;;  %v3716_v49 = vmov 0  }
  0xcf   :  { %1290 = vmatpush1.bf16.msra.mxu1 %v3544_v45  ;;  %3306 = vset.pattern.permute.xlu0 %v3716_v49 }
  0xd0   :  { %1291 = vmatprep.subr.bf16.mxu1 %v3545_v46  ;;  %1491 = vperm.xlu0 %3306, %v3925_v48  }
  0xd1   :  { %983 = vmatpush1.bf16.msra.mxu0 %v3440_v50  ;;  %v3717_v50 = vmov 1  }
  0xd2   :  { %984 = vmatprep.subr.bf16.mxu0 %v3445_v51  ;;  %v226_v51 = vlaneseq }
  0xd3   :  { %1292 = vmatpush1.bf16.msra.mxu1 %v3547_v47 }
  0xd4   :  { %3307 = vset.pattern.permute.xlu0 %v3717_v50 }
  0xd5   :  { %985 = vmatpush1.bf16.msra.mxu0 %v3443_v52  ;;  %1497 = vperm.xlu0 %3307, %v3925_v48   ;;  %v3930_v52 = vshrl.u32 %v226_v51, 7 }
  0xd6   :  { %986 = vmatprep.subr.bf16.mxu0 %v3448_v53 }
  0xd7   :  { %v3933_v53 = vsub.s32 0, %v3930_v52 }
  0xd9   :  { %987 = vmatpush1.bf16.msra.mxu0 %v3446_v54  ;;  %v224_v54 = vld [vmem:[%s4279_s5] ss:$8 sm:$0x3] }
  0xda   :  { %988 = vmatprep.subr.bf16.mxu0 %v3451_v55  ;;  %v3939_v55 = vsub.s32 1, %v3930_v52 }
  0xdc   :  { %v233_v57 = vrot.slane %v224_v54, %v3939_v55  ;;  %v1098_v31 = vrot.slane %v3036_v29, %v3939_v55 }
  0xdd   :  { %989 = vmatpush1.bf16.msra.mxu0 %v3449_v56  ;;  %v229_v56 = vrot.slane %v224_v54, %v3933_v53  ;;  %v4000_v54 = vld [vmem:[%s4278_s4] ss:$20 sps:$4 sm:$0xff]  }
  0xde   :  { %999 = vmatprep.subr.bf16.mxu0 %v3454_v58 }
  0xe0   :  { %991 = vmatmul.mubr.bf16.vlgmr.msra.gmra.mrb[0].mxu0 %v220_v60 }
  0xe1   :  { %1000 = vmatpush1.bf16.msra.mxu0 %v3452_v61  ;;  %1031 = vmatprep.mubr.bf16.mxu0 %v223_v62 }
  0xe2   :  { %1001 = vmatprep.subr.bf16.mxu0 %v3457_v63 }
  0xe5   :  { %1002 = vmatpush1.bf16.msra.mxu0 %v3455_v0 }
  0xe6   :  { %1003 = vmatprep.subr.bf16.mxu0 %v3460_v1 }
  0xe9   :  { %1004 = vmatpush1.bf16.msra.mxu0 %v3458_v2 }
  0xea   :  { %1005 = vmatprep.subr.bf16.mxu0 %v3463_v3 }
  0xed   :  { %1006 = vmatpush1.bf16.msra.mxu0 %v3461_v4 }
  0xee   :  { %1007 = vmatprep.subr.bf16.mxu0 %v3466_v5 }
  0xf1   :  { %1008 = vmatpush1.bf16.msra.mxu0 %v3464_v6 }
  0xf2   :  { %1009 = vmatprep.subr.bf16.mxu0 %v3469_v7 }
  0xf5   :  { %1010 = vmatpush1.bf16.msra.mxu0 %v3467_v8 }
  0xf6   :  { %1011 = vmatprep.subr.bf16.mxu0 %v3472_v9 }
  0xf9   :  { %1012 = vmatpush1.bf16.msra.mxu0 %v3470_v10 }
  0xfa   :  { %1013 = vmatprep.subr.bf16.mxu0 %v3475_v11 }
  0xfd   :  { %1014 = vmatpush1.bf16.msra.mxu0 %v3473_v12  ;;  %v3548_v12 = vld [vmem:[%s4277_s3 + $0xc8] ss:$12 sps:$4 sm:$0xff]  }
  0xfe   :  { %1015 = vmatprep.subr.bf16.mxu0 %v3478_v13  ;;  %v3549_v13 = vld [vmem:[%s4277_s3 + $0x8] ss:$12 sps:$4 sm:$0xff]   ;;  %3133 = vmatprep.subr.bf16.mxu1 %v3548_v12 }
 0x101   :  { %1016 = vmatpush1.bf16.msra.mxu0 %v3476_v14  ;;  %v3550_v14 = vld [vmem:[%s4277_s3 + $0xe0] ss:$12 sps:$4 sm:$0xff]  }
 0x102   :  { %1017 = vmatprep.subr.bf16.mxu0 %v3481_v15  ;;  %v3551_v15 = vld [vmem:[%s4277_s3 + $0x20] ss:$12 sps:$4 sm:$0xff]  }
 0x105   :  { %1018 = vmatpush1.bf16.msra.mxu0 %v3479_v16  ;;  %v3552_v16 = vld [vmem:[%s4277_s3 + $0xf8] ss:$12 sps:$4 sm:$0xff]  }
 0x106   :  { %1019 = vmatprep.subr.bf16.mxu0 %v3484_v17  ;;  %v3553_v17 = vld [vmem:[%s4277_s3 + $0x38] ss:$12 sps:$4 sm:$0xff]  }
 0x109   :  { %1020 = vmatpush1.bf16.msra.mxu0 %v3482_v18  ;;  %v3554_v18 = vld [vmem:[%s4277_s3 + $0x110] ss:$12 sps:$4 sm:$0xff]  }
 0x10a   :  { %1021 = vmatprep.subr.bf16.mxu0 %v3487_v19  ;;  %v3555_v19 = vld [vmem:[%s4277_s3 + $0x50] ss:$12 sps:$4 sm:$0xff]  }
 0x10d   :  { %1022 = vmatpush1.bf16.msra.mxu0 %v3485_v20  ;;  %v3556_v20 = vld [vmem:[%s4277_s3 + $0x128] ss:$12 sps:$4 sm:$0xff]  }
 0x10e   :  { %1023 = vmatprep.subr.bf16.mxu0 %v3490_v21  ;;  %v3557_v21 = vld [vmem:[%s4277_s3 + $0x68] ss:$12 sps:$4 sm:$0xff]  }
 0x111   :  { %1024 = vmatpush1.bf16.msra.mxu0 %v3488_v22  ;;  %v3558_v22 = vld [vmem:[%s4277_s3 + $0x140] ss:$12 sps:$4 sm:$0xff]  }
 0x112   :  { %1025 = vmatprep.subr.bf16.mxu0 %v3493_v23  ;;  %v3559_v23 = vld [vmem:[%s4277_s3 + $0x80] ss:$12 sps:$4 sm:$0xff]  }
 0x115   :  { %1026 = vmatpush1.bf16.msra.mxu0 %v3491_v24  ;;  %v3560_v24 = vld [vmem:[%s4277_s3 + $0x158] ss:$12 sps:$4 sm:$0xff]  }
 0x116   :  { %1027 = vmatprep.subr.bf16.mxu0 %v3496_v25  ;;  %v3561_v25 = vld [vmem:[%s4277_s3 + $0x98] ss:$12 sps:$4 sm:$0xff]  }
 0x119   :  { %1028 = vmatpush1.bf16.msra.mxu0 %v3494_v26  ;;  %v3562_v26 = vld [vmem:[%s4277_s3 + $0x170] ss:$12 sps:$4 sm:$0xff]  }
 0x11a   :  { %1029 = vmatprep.subr.bf16.mxu0 %v3499_v27  ;;  %v3563_v27 = vld [vmem:[%s4277_s3 + $0xb0] ss:$12 sps:$4 sm:$0xff]  }
 0x11d   :  { %1030 = vmatpush1.bf16.msra.mxu0 %v3497_v28  ;;  %v3718_v28 = vmov 0.0  }
 0x120   :  { %1032 = vmatmul.mubr.bf16.vlgmr.msra.gmra.mrb[0].mxu0 %v222_v30  ;;  %v1094_v30 = vrot.slane %v3036_v29, %v3933_v53 }
 0x14f   :  { %v1492_v45 = vpop.permute.xlu0 %1491 }
 0x1f3   :  { %v1033_v58 = vpop.f32.mrb[0].mxu0 }
 0x1f4   :  { %v3257_v59 = vadd.f32 %v1033_v58, %v229_v56  ;;  %v1035_v60 = vpop.f32.mrb[1].mxu0  ;;  %v1495_v58 = vld [vmem:[%s4279_s5 + $0x16] ss:$0 sm:$0xff] }
 0x1f5   :  { %v3258_v61 = vadd.f32 %v1035_v60, %v233_v57  ;;  %v1037_v62 = vpop.f32.mrb[2].mxu0  ;;  %v1488_v57 = vld [vmem:[%s4279_s5 + $0x15] ss:$0 sm:$0xff]  ;;  %v4012_v60 = vld [vmem:[%s4278_s4 + $0x28] ss:$20 sps:$4 sm:$0xff]  }
 0x1f6   :  { %v3034_v63 = vmul.f32 -1.442695, %v3257_v59  ;;  %v1038_v0 = vpop.f32.mrb[3].mxu0 }
 0x1f7   :  { %v3035_v1 = vmul.f32 -1.442695, %v3258_v61 }
 0x1f8   :  { %3588 = vpow2.f32 %v3034_v63  ;;  %v4021_v63 = vld [vmem:[%s4278_s4 + $0x50] ss:$20 sps:$4 sm:$0xff]  }
 0x1f9   :  { %3590 = vpow2.f32 %v3035_v1  ;;  %v1502_v1 = vld [vmem:[%s4279_s5 + $0x3] ss:$0 sm:$0xff] }
 0x202   :  { %v3589_v2 = vpop.eup %3588 }
 0x203   :  { %v3591_v3 = vpop.eup %3590  ;;  %v1046_v4 = vadd.f32 1.0, %v3589_v2  ;;  %v4031_v2 = vld [vmem:[%s4278_s4 + $0x78] ss:$20 sps:$4 sm:$0xff]  }
 0x204   :  { %v1047_v5 = vadd.f32 1.0, %v3591_v3 }
 0x205   :  { %3592 = vrcp.f32 %v1046_v4 }
 0x206   :  { %3594 = vrcp.f32 %v1047_v5  ;;  %v4042_v5 = vld [vmem:[%s4278_s4 + $0x4] ss:$20 sps:$4 sm:$0xff]  }
 0x20f   :  { %v3593_v6 = vpop.eup %3592 }
 0x210   :  { %v3595_v7 = vpop.eup %3594  ;;  %v1052_v8 = vmul.f32 %v3593_v6, %v3257_v59  ;;  %v1498_v59 = vpop.permute.xlu0 %1497  ;;  %v4049_v6 = vld [vmem:[%s4278_s4 + $0x2c] ss:$20 sps:$4 sm:$0xff]  }
 0x211   :  { %v1053_v9 = vmul.f32 %v3595_v7, %v3258_v61  ;;  %v1494_v61 = vmul.f32 %v1492_v45, %v1488_v57  ;;  %v1500_v62 = vmul.f32 %v1498_v59, %v1495_v58  ;;  %v4056_v7 = vld [vmem:[%s4278_s4 + $0x54] ss:$20 sps:$4 sm:$0xff]   ;;  %v3578_v57 = vld [vmem:[%s4278_s4 + $0x58] ss:$20 sps:$4 sm:$0xff]  }
 0x212   :  { %v1086_v11 = vpack.c.bf16 %v1052_v8, %v1052_v8  ;;  %v4063_v8 = vld [vmem:[%s4278_s4 + $0x7c] ss:$20 sps:$4 sm:$0xff]   ;;  %v3583_v58 = vld [vmem:[%s4278_s4 + $0x84] ss:$20 sps:$4 sm:$0xff]   ;;  %v3581_v59 = vld [vmem:[%s4278_s4 + $0x80] ss:$20 sps:$4 sm:$0xff]  }
 0x213   :  { %v1087_v10 = vpack.c.bf16 %v1053_v9, %v1053_v9  ;;  %v1501_v0 = vadd.f32 %v1500_v62, %v1494_v61  ;;  %v3572_v45 = vld [vmem:[%s4278_s4 + $0x8] ss:$20 sps:$4 sm:$0xff]  }
 0x215   :  { %1293 = vmatprep.mubr.bf16.mxu1 %v1087_v10  ;;  %v1503_v3 = vadd.f32 %v1502_v1, %v1501_v0 }
 0x216   :  { %1294 = vmatmul.mubr.bf16.vlgmr.msra.gmra.mrb[0].mxu1 %v1086_v11 }
 0x217   :  { %3134 = vmatpush3.bf16.msra.mxu1 %v3549_v13  ;;  %v1512_v4 = vpack.c.bf16 %v1503_v3, %v1503_v3 }
 0x218   :  { %3135 = vmatprep.subr.bf16.mxu1 %v3550_v14  ;;  %v1581_v14 = vld [vmem:[%s4279_s5 + $0x4] ss:$0 sm:$0xff] }
 0x21b   :  { %3136 = vmatpush3.bf16.msra.mxu1 %v3551_v15 }
 0x21c   :  { %3137 = vmatprep.subr.bf16.mxu1 %v3552_v16 }
 0x21f   :  { %3138 = vmatpush3.bf16.msra.mxu1 %v3553_v17 }
 0x220   :  { %3139 = vmatprep.subr.bf16.mxu1 %v3554_v18 }
 0x223   :  { %3140 = vmatpush3.bf16.msra.mxu1 %v3555_v19 }
 0x224   :  { %3141 = vmatprep.subr.bf16.mxu1 %v3556_v20 }
 0x227   :  { %3142 = vmatpush3.bf16.msra.mxu1 %v3557_v21  ;;  %v1350_v21 = vld [vmem:[%s4279_s5 + $0x2] ss:$0 sm:$0xff] }
 0x228   :  { %3143 = vmatprep.subr.bf16.mxu1 %v3558_v22 }
 0x22b   :  { %3144 = vmatpush3.bf16.msra.mxu1 %v3559_v23 }
 0x22c   :  { %3145 = vmatprep.subr.bf16.mxu1 %v3560_v24  ;;  %v1659_v24 = vld [vmem:[%s4279_s5 + $0x5] ss:$0 sm:$0xff] }
 0x22f   :  { %3146 = vmatpush3.bf16.msra.mxu1 %v3561_v25 }
 0x230   :  { %3147 = vmatprep.subr.bf16.mxu1 %v3562_v26 }
 0x233   :  { %3148 = vmatpush3.bf16.msra.mxu1 %v3563_v27 }
 0x234   :  { %3185 = vmatprep.subr.bf16.mxu1 %v3718_v28 }
 0x2e9   :  { %v1295_v32 = vpop.f32.mrb[0].mxu1 }
 0x2ea   :  { %v1296_v33 = vadd.f32 %v1295_v32, %v1094_v30  ;;  %v1297_v34 = vpop.f32.mrb[1].mxu1 }
 0x2eb   :  { %v1298_v35 = vadd.f32 %v1297_v34, %v1098_v31  ;;  %v1299_v36 = vpop.f32.mrb[2].mxu1 }
 0x2ec   :  { %v3069_v37 = vmul.f32 -1.442695, %v1296_v33  ;;  %v1300_v38 = vpop.f32.mrb[3].mxu1 }
 0x2ed   :  { %v3070_v39 = vmul.f32 -1.442695, %v1298_v35 }
 0x2ee   :  { %3596 = vpow2.f32 %v3069_v37 }
 0x2ef   :  { %3598 = vpow2.f32 %v3070_v39 }
 0x2f8   :  { %v3597_v40 = vpop.eup %3596 }
 0x2f9   :  { %v3599_v41 = vpop.eup %3598  ;;  %v1308_v42 = vadd.f32 1.0, %v3597_v40 }
 0x2fa   :  { %v1309_v43 = vadd.f32 1.0, %v3599_v41 }
 0x2fb   :  { %3600 = vrcp.f32 %v1308_v42 }
 0x2fc   :  { %3602 = vrcp.f32 %v1309_v43 }
 0x305   :  { %v3601_v44 = vpop.eup %3600 }
 0x306   :  { %v3603_v46 = vpop.eup %3602  ;;  %v1314_v47 = vmul.f32 %v3601_v44, %v1296_v33 }
 0x307   :  { %v1315_v50 = vmul.f32 %v3603_v46, %v1298_v35  ;;  %v3574_v46 = vld [vmem:[%s4278_s4 + $0xc] ss:$20 sps:$4 sm:$0xff]  }
 0x308   :  { %v1348_v56 = vpack.c.bf16 %v1314_v47, %v1314_v47  ;;  %v3577_v47 = vld [vmem:[%s4278_s4 + $0x34] ss:$20 sps:$4 sm:$0xff]  }
 0x309   :  { %v1349_v51 = vpack.c.bf16 %v1315_v50, %v1315_v50 }
 0x30b   :  { %1479 = vmatprep.mubr.bf16.mxu1 %v1349_v51  ;;  %v3575_v51 = vld [vmem:[%s4278_s4 + $0x30] ss:$20 sps:$4 sm:$0xff]  }
 0x30c   :  { %1480 = vmatmul.mubr.bf16.vlgmr.msra.gmra.mrb[4].mxu1 %v1348_v56  ;;  %v3580_v56 = vld [vmem:[%s4278_s4 + $0x5c] ss:$20 sps:$4 sm:$0xff]  }
 0x30d   :  { %3186 = vmatpush3.bf16.msra.mxu1 %v4000_v54  ;;  %3193 = vmatprep.mubr.msk.bf16.mxu1 %vm3719_vm0, %v3718_v28 }
 0x30e   :  { %3187 = vmatprep.subr.bf16.mxu1 %v3718_v28 }
 0x311   :  { %3188 = vmatpush3.bf16.msra.mxu1 %v4012_v60 }
 0x312   :  { %3189 = vmatprep.subr.bf16.mxu1 %v3718_v28 }
 0x315   :  { %3190 = vmatpush3.bf16.msra.mxu1 %v4021_v63 }
 0x316   :  { %3191 = vmatprep.subr.bf16.mxu1 %v3718_v28 }
 0x319   :  { %3192 = vmatpush3.bf16.msra.mxu1 %v4031_v2 }
 0x31a   :  { %3197 = vmatprep.subr.bf16.mxu1 %v3718_v28 }
 0x31c   :  { %3194 = vmatmul.mubr.msk.bf16.vlgmr.msra.gmra.mrb[8].mxu1 %vm1537_vm1, %v1512_v4 }
 0x31d   :  { %3205 = vmatprep.mubr.msk.bf16.mxu1 %vm3719_vm0, %v3718_v28  ;;  %3198 = vmatpush3.bf16.msra.mxu1 %v4042_v5 }
 0x31e   :  { %3199 = vmatprep.subr.bf16.mxu1 %v3718_v28 }
 0x321   :  { %3200 = vmatpush3.bf16.msra.mxu1 %v4049_v6 }
 0x322   :  { %3201 = vmatprep.subr.bf16.mxu1 %v3718_v28 }
 0x325   :  { %3202 = vmatpush3.bf16.msra.mxu1 %v4056_v7 }
 0x326   :  { %3203 = vmatprep.subr.bf16.mxu1 %v3718_v28 }
 0x329   :  { %3204 = vmatpush3.bf16.msra.mxu1 %v4063_v8 }
 0x32a   :  { %1793 = vmatprep.subr.bf16.mxu1 %v3574_v46 }
 0x3df   :  { %v3149_v9 = vpop.f32.mrb[4].mxu1 }
 0x3e0   :  { %v3150_v10 = vpop.f32.mrb[5].mxu1 }
 0x3e1   :  { %v3151_v11 = vadd.f32 %v3150_v10, %v3149_v9  ;;  %v3152_v12 = vpop.f32.mrb[6].mxu1 }
 0x3e2   :  { %v3153_v13 = vpop.f32.mrb[7].mxu1 }
 0x3e3   :  { %v1482_v22 = vadd.f32 %v3151_v11, %v1350_v21 }
 0x3e5   :  { %v1661_v23 = vmul.f32 1.442695, %v1482_v22 }
 0x3e7   :  { %3604 = vpow2.f32 %v1661_v23 }
 0x3ef   :  { %v1575_v15 = vpop.f32.mrb[8].mxu1 }
 0x3f0   :  { %v1582_v16 = vadd.f32 %v1581_v14, %v1575_v15  ;;  %v3195_v17 = vpop.f32.mrb[9].mxu1 }
 0x3f1   :  { %v1578_v18 = vpop.f32.mrb[10].mxu1  ;;  %v3605_v32 = vpop.eup %3604  ;;  %v4129_v17 = vld [vmem:[%s4278_s4 + $0x60] ss:$20 sps:$4 sm:$0xff]  }
 0x3f2   :  { %v1591_v19 = vpack.c.bf16 %v1582_v16, %v1582_v16  ;;  %v3196_v20 = vpop.f32.mrb[11].mxu1  ;;  %v4120_v16 = vld [vmem:[%s4278_s4 + $0x38] ss:$20 sps:$4 sm:$0xff]   ;;  %v4136_v18 = vld [vmem:[%s4278_s4 + $0x88] ss:$20 sps:$4 sm:$0xff]  }
 0x3f4   :  { %3206 = vmatmul.mubr.msk.bf16.vlgmr.msra.gmra.mrb[12].mxu1 %vm1537_vm1, %v1591_v19 }
 0x3f5   :  { %1825 = vmatprep.mubr.bf16.mxu1 %v3716_v49  ;;  %v1663_v49 = vadd.f32 2e-08, %v3605_v32  ;;  %1794 = vmatpush1.bf16.msra.mxu1 %v3572_v45 }
 0x3f6   :  { %1795 = vmatprep.subr.bf16.mxu1 %v3577_v47 }
 0x3f9   :  { %1796 = vmatpush1.bf16.msra.mxu1 %v3575_v51 }
 0x3fa   :  { %1797 = vmatprep.subr.bf16.mxu1 %v3580_v56 }
 0x3fd   :  { %1798 = vmatpush1.bf16.msra.mxu1 %v3578_v57 }
 0x3fe   :  { %1799 = vmatprep.subr.bf16.mxu1 %v3583_v58 }
 0x401   :  { %1800 = vmatpush1.bf16.msra.mxu1 %v3581_v59 }
 0x402   :  { %3209 = vmatprep.subr.bf16.mxu1 %v3718_v28 }
 0x4c7   :  { %v1653_v25 = vpop.f32.mrb[12].mxu1 }
 0x4c8   :  { %v1660_v26 = vadd.f32 %v1659_v24, %v1653_v25  ;;  %v3207_v27 = vpop.f32.mrb[13].mxu1 }
 0x4c9   :  { %v1656_v29 = vpop.f32.mrb[14].mxu1  ;;  %v1903_v27 = vld [vmem:[%s4279_s5 + $0x11] ss:$0 sm:$0xff] }
 0x4ca   :  { %v1666_v30 = vmul.f32 1.442695, %v1660_v26  ;;  %v3208_v31 = vpop.f32.mrb[15].mxu1 }
 0x4cc   :  { %3606 = vpow2.f32 %v1666_v30 }
 0x4cd   :  { %3608 = vrcp.f32 %v1663_v49 }
 0x4d6   :  { %v3607_v33 = vpop.eup %3606 }
 0x4d7   :  { %v1668_v34 = vadd.f32 2e-08, %v3607_v33  ;;  %v3609_v35 = vpop.eup %3608 }
 0x4d8   :  { %v1671_v36 = vadd.f32 1.0, %v3609_v35 }
 0x4d9   :  { %3610 = vrcp.f32 %v1668_v34 }
 0x4e3   :  { %v3611_v37 = vpop.eup %3610 }
 0x4e4   :  { %v1672_v38 = vadd.f32 %v3611_v37, %v1671_v36 }
 0x4e6   :  { %3612 = vrcp.f32 %v1672_v38 }
 0x4f0   :  { %v3613_v39 = vpop.eup %3612 }
 0x4f1   :  { %1687 = vrot.lane.b32.xlu0 %v3613_v39, %s3720_s20  ;;  %v1691_v40 = vadd.f32 1e-08, %v3613_v39 }
 0x4f3   :  { %3614 = vlog2.f32 %v1691_v40 }
 0x4fd   :  { %v3615_v41 = vpop.eup %3614 }
 0x4fe   :  { %v4077_v42 = vmul.f32 0.6931472, %v3615_v41 }
 0x500   :  { %v1694_v43 = vmul.f32 0.5, %v4077_v42 }
 0x502   :  { %v1695_v44 = vmul.f32 1.442695, %v1694_v43 }
 0x504   :  { %3616 = vpow2.f32 %v1695_v44 }
 0x50e   :  { %v3617_v50 = vpop.eup %3616 }
 0x50f   :  { %1698 = vrot.lane.b32.xlu1 %v3617_v50, %s3721_s27 }
 0x513   :  { %1676 = vrot.lane.b32.xlu1 %v3609_v35, %s3720_s20 }
 0x517   :  { %1681 = vrot.lane.b32.xlu1 %v3611_v37, %s3720_s20 }
 0x563   :  { %v1688_v10 = vpop.permute.xlu0 %1687 }
 0x581   :  { %v1699_v61 = vpop.permute.xlu1 %1698 }
 0x582   :  { %v1701_v62 = vmul.f32 %v1699_v61, %v3925_v48  ;;  %v4113_v48 = vld [vmem:[%s4278_s4 + $0x10] ss:$20 sps:$4 sm:$0xff]  }
 0x584   :  { %1703 = vrot.lane.b32.xlu1 %v1701_v62, %s3722_s15 }
 0x585   :  { %v1677_v0 = vpop.permute.xlu1 %1676 }
 0x586   :  { %v1679_v4 = vmul.f32 %v1677_v0, %v1482_v22 }
 0x589   :  { %v1682_v1 = vpop.permute.xlu1 %1681 }
 0x58a   :  { %v1684_v3 = vmul.f32 %v1682_v1, %v1660_v26 }
 0x58c   :  { %v1685_v9 = vadd.f32 %v1684_v3, %v1679_v4 }
 0x58e   :  { %v4106_v11 = vmul.f32 %v1688_v10, %v1685_v9 }
 0x5f6   :  { %v1704_v12 = vpop.permute.xlu1 %1703 }
 0x5f7   :  { %v1706_v13 = vadd.f32 %v1704_v12, %v4106_v11 }
 0x5f9   :  { %v1708_v14 = vsel %vm1707_vm2, %v1706_v13, 0.0 }
 0x5fa   :  { %v1725_v15 = vpack.c.bf16 %v1708_v14, %v1708_v14 }
 0x5fc   :  { %3109 = vmatmul.mubr.msk.bf16.vlgmr.msra.gmra.mrb[16].mxu1 %vm1537_vm1, %v1725_v15 }
 0x5fd   :  { %3210 = vmatpush3.bf16.msra.mxu1 %v4113_v48  ;;  %3217 = vmatprep.mubr.msk.bf16.mxu1 %vm3719_vm0, %v3718_v28 }
 0x5fe   :  { %3211 = vmatprep.subr.bf16.mxu1 %v3718_v28 }
 0x601   :  { %3212 = vmatpush3.bf16.msra.mxu1 %v4120_v16 }
 0x602   :  { %3213 = vmatprep.subr.bf16.mxu1 %v3718_v28 }
 0x605   :  { %3214 = vmatpush3.bf16.msra.mxu1 %v4129_v17 }
 0x606   :  { %3215 = vmatprep.subr.bf16.mxu1 %v3718_v28 }
 0x609   :  { %3216 = vmatpush3.bf16.msra.mxu1 %v4136_v18 }
 0x60a   :  { %3221 = vmatprep.subr.bf16.mxu1 %v3718_v28 }
 0x60c   :  { %3218 = vmatmul.mubr.msk.bf16.vlgmr.msra.gmra.mrb[20].mxu1 %vm1537_vm1, %v1725_v15 }
 0x60d   :  { %3222 = vmatpush3.bf16.msra.mxu1 %v4000_v54  ;;  %3229 = vmatprep.mubr.msk.bf16.mxu1 %vm3719_vm0, %v3718_v28  ;;  %v1949_v54 = vld [vmem:[%s4279_s5 + $0x12] ss:$0 sm:$0xff] }
 0x60e   :  { %3223 = vmatprep.subr.bf16.mxu1 %v3718_v28  ;;  %1951 = vrot.lane.b32.xlu0 %v1949_v54, %s3709_s26 }
 0x611   :  { %3224 = vmatpush3.bf16.msra.mxu1 %v4012_v60  ;;  %v3111_v60 = vld [vmem:[%s4279_s5 + $0x6] ss:$8 sm:$0x3] }
 0x612   :  { %3225 = vmatprep.subr.bf16.mxu1 %v3718_v28  ;;  %v1880_v19 = vrot.slane %v3111_v60, %v3933_v53 }
 0x615   :  { %3226 = vmatpush3.bf16.msra.mxu1 %v4021_v63  ;;  %v1884_v63 = vrot.slane %v3111_v60, %v3939_v55 }
 0x616   :  { %3227 = vmatprep.subr.bf16.mxu1 %v3718_v28 }
 0x619   :  { %3228 = vmatpush3.bf16.msra.mxu1 %v4031_v2 }
 0x61a   :  { %3233 = vmatprep.subr.bf16.mxu1 %v3718_v28 }
 0x6cf   :  { %v1827_v20 = vpop.f32.mrb[16].mxu1 }
 0x6d0   :  { %v1887_v21 = vadd.f32 %v1880_v19, %v1827_v20  ;;  %v1829_v22 = vpop.f32.mrb[17].mxu1 }
 0x6d1   :  { %v1888_v2 = vadd.f32 %v1884_v63, %v1829_v22  ;;  %v1831_v23 = vpop.f32.mrb[18].mxu1 }
 0x6d2   :  { %v3112_v24 = vmul.f32 -1.442695, %v1887_v21  ;;  %v1832_v25 = vpop.f32.mrb[19].mxu1 }
 0x6d3   :  { %v3113_v26 = vmul.f32 -1.442695, %v1888_v2 }
 0x6d4   :  { %3618 = vpow2.f32 %v3112_v24 }
 0x6d5   :  { %3620 = vpow2.f32 %v3113_v26 }
 0x6de   :  { %v3619_v29 = vpop.eup %3618 }
 0x6df   :  { %v3621_v30 = vpop.eup %3620  ;;  %v1895_v31 = vadd.f32 1.0, %v3619_v29  ;;  %v1868_v32 = vpop.f32.mrb[20].mxu1 }
 0x6e0   :  { %v1896_v49 = vadd.f32 1.0, %v3621_v30  ;;  %v1904_v33 = vadd.f32 %v1903_v27, %v1868_v32  ;;  %v3219_v34 = vpop.f32.mrb[21].mxu1  ;;  %v3725_v32 = vmov 683565275  }
 0x6e1   :  { %3622 = vrcp.f32 %v1895_v31  ;;  %v1871_v35 = vpop.f32.mrb[22].mxu1 }
 0x6e2   :  { %3624 = vrcp.f32 %v1896_v49  ;;  %v1905_v36 = vpack.c.bf16 %v1904_v33, %v1904_v33  ;;  %v3220_v37 = vpop.f32.mrb[23].mxu1  ;;  %v3726_v33 = vmov 2475754826  }
 0x6e4   :  { %3230 = vmatmul.mubr.msk.bf16.vlgmr.msra.gmra.mrb[24].mxu1 %vm1537_vm1, %v1905_v36  ;;  %v3727_v36 = vmov 2131351028  }
 0x6e5   :  { %3234 = vmatpush3.bf16.msra.mxu1 %v4042_v5  ;;  %3241 = vmatprep.mubr.msk.bf16.mxu1 %vm3719_vm0, %v3718_v28  ;;  %v2002_v5 = vld [vmem:[%s4279_s5 + $0x13] ss:$0 sm:$0xff] }
 0x6e6   :  { %3235 = vmatprep.subr.bf16.mxu1 %v3718_v28  ;;  %2004 = vrot.lane.b32.xlu0 %v2002_v5, %s3709_s26 }
 0x6e9   :  { %3236 = vmatpush3.bf16.msra.mxu1 %v4049_v6  ;;  %v1952_v6 = vpop.permute.xlu0 %1951 }
 0x6ea   :  { %3237 = vmatprep.subr.bf16.mxu1 %v3718_v28 }
 0x6eb   :  { %v3623_v38 = vpop.eup %3622 }
 0x6ec   :  { %v3625_v39 = vpop.eup %3624  ;;  %v4171_v40 = vmul.f32 %v3623_v38, %v1887_v21 }
 0x6ed   :  { %v4173_v41 = vmul.f32 %v3625_v39, %v1888_v2  ;;  %3238 = vmatpush3.bf16.msra.mxu1 %v4056_v7  ;;  %v3728_v39 = vmov 2102212464  }
 0x6ee   :  { %3239 = vmatprep.subr.bf16.mxu1 %v3718_v28 }
 0x6f1   :  { %3240 = vmatpush3.bf16.msra.mxu1 %v4063_v8  ;;  %v2055_v8 = vld [vmem:[%s4279_s5 + $0x14] ss:$0 sm:$0xff] }
 0x6f2   :  { %3245 = vmatprep.subr.bf16.mxu1 %v3718_v28  ;;  %2057 = vrot.lane.b32.xlu0 %v2055_v8, %s3709_s26 }
 0x758   :  { %v2005_v51 = vpop.permute.xlu0 %2004 }
 0x7b7   :  { %v1943_v43 = vpop.f32.mrb[24].mxu1 }
 0x7b8   :  { %v1954_v44 = vadd.f32 %v1952_v6, %v1943_v43  ;;  %v3231_v45 = vpop.f32.mrb[25].mxu1  ;;  %v3729_v43 = vmov 920167782  }
 0x7b9   :  { %v1946_v46 = vpop.f32.mrb[26].mxu1 }
 0x7ba   :  { %v1955_v47 = vpack.c.bf16 %v1954_v44, %v1954_v44  ;;  %v3232_v50 = vpop.f32.mrb[27].mxu1  ;;  %v3730_v46 = vmov 1326507024  }
 0x7bc   :  { %1957 = vrot.lane.b32.xlu1 %v1955_v47, %s3709_s26 }
 0x82e   :  { %v1958_v7 = vpop.permute.xlu1 %1957 }
 0x82f   :  { %3242 = vmatmul.mubr.msk.bf16.vlgmr.msra.gmra.mrb[28].mxu1 %vm1537_vm1, %v1958_v7 }
 0x830   :  { %3246 = vmatpush3.bf16.msra.mxu1 %v4113_v48  ;;  %3253 = vmatprep.mubr.msk.bf16.mxu1 %vm3719_vm0, %v3718_v28 }
 0x831   :  { %3247 = vmatprep.subr.bf16.mxu1 %v3718_v28 }
 0x834   :  { %3248 = vmatpush3.bf16.msra.mxu1 %v4120_v16 }
 0x835   :  { %3249 = vmatprep.subr.bf16.mxu1 %v3718_v28 }
 0x838   :  { %3250 = vmatpush3.bf16.msra.mxu1 %v4129_v17 }
 0x839   :  { %3251 = vmatprep.subr.bf16.mxu1 %v3718_v28  ;;  %v2058_v28 = vpop.permute.xlu0 %2057 }
 0x83c   :  { %3252 = vmatpush3.bf16.msra.mxu1 %v4136_v18 }
 0x902   :  { %v1996_v56 = vpop.f32.mrb[28].mxu1 }
 0x903   :  { %v2007_v57 = vadd.f32 %v2005_v51, %v1996_v56  ;;  %v3243_v58 = vpop.f32.mrb[29].mxu1 }
 0x904   :  { %v1999_v59 = vpop.f32.mrb[30].mxu1 }
 0x905   :  { %v2008_v61 = vpack.c.bf16 %v2007_v57, %v2007_v57  ;;  %v3244_v62 = vpop.f32.mrb[31].mxu1 }
 0x907   :  { %2010 = vrot.lane.b32.xlu1 %v2008_v61, %s3709_s26 }
 0x979   :  { %v2011_v0 = vpop.permute.xlu1 %2010 }
 0x97a   :  { %3254 = vmatmul.mubr.msk.bf16.vlgmr.msra.gmra.mrb[32].mxu1 %vm1537_vm1, %v2011_v0 }
 0xa4d   :  { %v2049_v1 = vpop.f32.mrb[32].mxu1 }
 0xa4e   :  { %v2060_v3 = vadd.f32 %v2058_v28, %v2049_v1  ;;  %v3255_v4 = vpop.f32.mrb[33].mxu1 }
 0xa4f   :  { %v2052_v9 = vpop.f32.mrb[34].mxu1 }
 0xa50   :  { %v3256_v10 = vpop.f32.mrb[35].mxu1  ;;  %v2066_v12 = vsel %vm2065_vm3, %v2060_v3, -inf }
 0xa51   :  { %2067 = vmax.xlane.f32.xlu1 %v2066_v12 }
 0xa62   :  { %2082 = vrot.lane.b32.xlu1 %v2055_v8, %s3723_s2 }
 0xade   :  { %v2068_v13 = vpop.xlane.xlu1 %2067 }
 0xadf   :  { %v2069_v14 = vsub.f32 %v2060_v3, %v2068_v13 }
 0xae1   :  { %v2070_v48 = vmul.f32 1.442695, %v2069_v14 }
 0xae2   :  { %v2083_v22 = vpop.permute.xlu1 %2082 }
 0xae3   :  { %3626 = vpow2.f32 %v2070_v48 }
 0xaed   :  { %v3627_v15 = vpop.eup %3626 }
 0xaee   :  { %2073 = vrot.lane.b32.xlu0 %v3627_v15, %s3709_s26 }
 0xb60   :  { %v2074_v16 = vpop.permute.xlu0 %2073 }
 0xb61   :  { %v2077_v17 = vsel %vm2076_vm4, %v2074_v16, 0.0 }
 0xb62   :  { %2078 = vadd.xlane.f32.xlu0 %v2077_v17 }
 0xb78   :  { %2061 = vrot.lane.b32.xlu0 %v2055_v8, %s3724_s1 }
 0xbef   :  { %v2079_v18 = vpop.xlane.xlu0 %2078 }
 0xbf0   :  { %3628 = vrcp.f32 %v2079_v18 }
 0xbf3   :  { %v2062_v54 = vpop.permute.xlu0 %2061 }
 0xbf4   :  { %v4202_v60 = vadd.f32 %v2062_v54, %v2049_v1 }
 0xbf6   :  { %v2096_v19 = vand.u32 2139095040, %v4202_v60  ;;  %v2093_v25 = vand.u32 2147483647, %v4202_v60  ;;  %vm2095_vm12 = vcmp.lt.s32.totalorder %v4202_v60, 0 }
 0xbf8   :  { %v2097_v63 = vshrl.u32 %v2096_v19, 23  ;;  %v2100_v29 = vand.u32 8388607, %v2093_v25  ;;  %vm2094_vm13 = vcmp.le.f32.partialorder %v2093_v25, 0.7853982 }
 0xbfa   :  { %v3629_v20 = vpop.eup %3628  ;;  %v3117_v21 = vadd.s32 4294967169, %v2097_v63  ;;  %v2101_v50 = vor.u32 8388608, %v2100_v29 }
 0xbfb   :  { %v2081_v2 = vmul.f32 %v3629_v20, %v3627_v15 }
 0xbfc   :  { %v2103_v23 = vadd.s32 1, %v3117_v21  ;;  %v2141_v4 = vshll.u32 %v2101_v50, 8 }
 0xbfd   :  { %v2085_v24 = vmul.f32 %v2083_v22, %v2081_v2 }
 0xbfe   :  { %vm2104_vm5 = vcmp.gt.s32.totalorder %v2103_v23, 0 }
 0xbff   :  { %v2105_v26 = vsel %vm2104_vm5, %v2103_v23, 0  ;;  %2087 = vrot.lane.b32.xlu1 %v2085_v24, %s3709_s26  ;;  %s3731_s26 = smov 59  }
 0xc00   :  { %v2107_v27 = vand.u32 31, %v2105_v26  ;;  %v2106_v31 = vshrl.u32 %v2105_v26, 5 }
 0xc02   :  { %v2108_v30 = vsub.s32 32, %v2107_v27  ;;  %v2110_v49 = vshll.u32 %v3725_v32, %v2107_v27  ;;  %v2113_v34 = vshll.u32 %v3726_v33, %v2107_v27  ;;  %v2116_v38 = vshll.u32 %v3727_v36, %v2107_v27 }
 0xc03   :  { %v2119_v6 = vshll.u32 %v3728_v39, %v2107_v27  ;;  %v2122_v45 = vshll.u32 %v3729_v43, %v2107_v27  ;;  %vm2125_vm6 = vcmp.lt.s32.totalorder %v2106_v31, 1  ;;  %vm2128_vm7 = vcmp.lt.s32.totalorder %v2106_v31, 4 }
 0xc04   :  { %v2111_v35 = vshrl.u32 %v3726_v33, %v2108_v30  ;;  %v2114_v37 = vshrl.u32 %v3727_v36, %v2108_v30  ;;  %v2117_v5 = vshrl.u32 %v3728_v39, %v2108_v30  ;;  %v2120_v44 = vshrl.u32 %v3729_v43, %v2108_v30 }
 0xc05   :  { %v2123_v47 = vshrl.u32 %v3730_v46, %v2108_v30  ;;  %v2109_v62 = vshrl.u32 %v3725_v32, %v2108_v30  ;;  %vm2127_vm8 = vcmp.lt.s32.totalorder %v2106_v31, 3  ;;  %vm2126_vm9 = vcmp.lt.s32.totalorder %v2106_v31, 2 }
 0xc06   :  { %v2112_v7 = vor.u32 %v2111_v35, %v2110_v49  ;;  %v2115_v8 = vor.u32 %v2114_v37, %v2113_v34  ;;  %v2118_v51 = vor.u32 %v2117_v5, %v2116_v38  ;;  %v2121_v56 = vor.u32 %v2120_v44, %v2119_v6 }
 0xc07   :  { %v2124_v57 = vor.u32 %v2123_v47, %v2122_v45 }
 0xc08   :  { %v2130_v58 = vsel %vm2128_vm7, %v2118_v51, 2102212464  ;;  %v2133_v59 = vsel %vm2125_vm6, %v2112_v7, %v2115_v8  ;;  %v2137_v61 = vsel %vm2125_vm6, %v2115_v8, %v2118_v51  ;;  %v2134_v0 = vsel %vm2128_vm7, %v2121_v56, 920167782 }
 0xc09   :  { %v2138_v28 = vsel %vm2128_vm7, %v2124_v57, 1326507024  ;;  %v2135_v1 = vsel %vm2127_vm8, %v2118_v51, %v2134_v0  ;;  %v2129_v9 = vsel %vm2125_vm6, %v2109_v62, %v2112_v7  ;;  %v2131_v10 = vsel %vm2127_vm8, %v2115_v8, %v2130_v58 }
 0xc0a   :  { %v2139_v3 = vsel %vm2127_vm8, %v2121_v56, %v2138_v28  ;;  %v2136_v12 = vsel %vm2126_vm9, %v2133_v59, %v2135_v1  ;;  %v2132_v17 = vsel %vm2126_vm9, %v2129_v9, %v2131_v10  ;;  %vm2185_vm6 = vweird.f32 %v4202_v60 }
 0xc0b   :  { %v2140_v13 = vsel %vm2126_vm9, %v2137_v61, %v2139_v3  ;;  %v4212_v15 = vmul.u32.u64.low %v2141_v4, %v2136_v12  ;;  %v4213_v16 = vmul.u32.u64.high %v2141_v4, %v2136_v12, %v4212_v15  ;;  %v2148_v54 = vmul.u32 %v2141_v4, %v2132_v17 }
 0xc0c   :  { %v4209_v14 = vmul.u32.u64.low %v2141_v4, %v2140_v13  ;;  %v4210_v48 = vmul.u32.u64.high %v2141_v4, %v2140_v13, %v4209_v14  ;;  %vm2309_vm7 = vcmask 7168   ;;  %vm2324_vm8 = vcmask 146432  }
 0xc0d   :  { %v2151_v18 = vadd.s32 1, %v4213_v16 }
 0xc0e   :  { %vm2150_vm10 = vc.u32 %v4210_v48, %v4212_v15  ;;  %v2149_v30 = vadd.s32 %v4212_v15, %v4210_v48 }
 0xc0f   :  { %v2152_v19 = vsel %vm2150_vm10, %v2151_v18, %v4213_v16  ;;  %v2321_v18 = vsel %vm1707_vm2, %v4106_v11, %v4077_v42 }
 0xc10   :  { %v2153_v63 = vadd.s32 %v2152_v19, %v2148_v54 }
 0xc12   :  { %v2154_v20 = vadd.s32 536870912, %v2153_v63 }
 0xc14   :  { %v2155_v21 = vshrl.u32 %v2154_v20, 30 }
 0xc16   :  { %v2156_v22 = vshll.u32 %v2155_v21, 30  ;;  %v2179_v6 = vsub.s32 4, %v2155_v21 }
 0xc18   :  { %v2157_v2 = vsub.s32 %v2153_v63, %v2156_v22  ;;  %v2180_v45 = vsel %vm2095_vm12, %v2179_v6, %v2155_v21 }
 0xc19   :  { %v2182_v47 = vsel %vm2094_vm13, 0, %v2180_v45 }
 0xc1a   :  { %v2159_v23 = vsub.s32 0, %v2157_v2  ;;  %v2290_v50 = vadd.s32 3, %v2182_v47  ;;  %v2186_v7 = vand.u32 3, %v2182_v47 }
 0xc1c   :  { %v3118_v24 = vmin.u32 %v2159_v23, %v2157_v2  ;;  %v2291_v8 = vand.u32 3, %v2290_v50  ;;  %vm2191_vm14 = vcmp.eq.s32.totalorder %v2186_v7, 2  ;;  %vm2188_vm0 = vcmp.eq.s32.totalorder %v2186_v7, 0 }
 0xc1d   :  { %vm2187_vm3 = vcmp.lt.s32.totalorder %v2186_v7, 2 }
 0xc1e   :  { %v2161_v26 = vclz %v3118_v24  ;;  %vm2296_vm15 = vcmp.eq.s32.totalorder %v2291_v8, 2  ;;  %vm2293_vm1 = vcmp.eq.s32.totalorder %v2291_v8, 0  ;;  %vm2292_vm5 = vcmp.lt.s32.totalorder %v2291_v8, 2 }
 0xc20   :  { %v3119_v27 = vadd.s32 4294967294, %v2161_v26 }
 0xc22   :  { %vm3120_vm11 = vcmp.lt.s32.totalorder %v3119_v27, 0 }
 0xc23   :  { %v2164_v29 = vsel %vm3120_vm11, 0, %v3119_v27 }
 0xc24   :  { %v2165_v31 = vsub.s32 32, %v2164_v29  ;;  %v2169_v32 = vsub.s32 4294967266, %v2164_v29  ;;  %v2166_v49 = vshll.u32 %v2157_v2, %v2164_v29 }
 0xc26   :  { %v2167_v33 = vshrl.u32 %v2149_v30, %v2165_v31  ;;  %v2170_v34 = vadd.s32 127, %v2169_v32 }
 0xc28   :  { %v2168_v35 = vor.u32 %v2167_v33, %v2166_v49  ;;  %v2171_v36 = vshll.u32 %v2170_v34, 23 }
 0xc2a   :  { %v2172_v37 = vor.u32 4788187, %v2171_v36  ;;  %v2175_v39 = vcvt.s32.f32 %v2168_v35 }
 0xc2c   :  { %v2173_v38 = vand.u32 2147483647, %v2172_v37 }
 0xc2e   :  { %v2176_v5 = vmul.f32 %v2175_v39, %v2173_v38 }
 0xc30   :  { %v2177_v43 = vxor.u32 2147483648, %v2176_v5 }
 0xc32   :  { %v2178_v44 = vsel %vm2095_vm12, %v2177_v43, %v2176_v5 }
 0xc33   :  { %v2181_v46 = vsel %vm2094_vm13, %v4202_v60, %v2178_v44 }
 0xc34   :  { %3630 = vcosq.f32 %v2181_v46 }
 0xc35   :  { %3632 = vsinq.f32 %v2181_v46 }
 0xc3e   :  { %v3631_v51 = vpop.eup %3630 }
 0xc3f   :  { %v3633_v56 = vpop.eup %3632  ;;  %v2192_v57 = vxor.u32 2147483648, %v3631_v51 }
 0xc40   :  { %v2189_v58 = vxor.u32 2147483648, %v3633_v56 }
 0xc41   :  { %v2193_v59 = vsel %vm2191_vm14, %v2192_v57, %v3633_v56  ;;  %v2298_v61 = vsel %vm2296_vm15, %v2192_v57, %v3633_v56 }
 0xc42   :  { %v2190_v25 = vsel %vm2188_vm0, %v3631_v51, %v2189_v58  ;;  %v2295_v62 = vsel %vm2293_vm1, %v3631_v51, %v2189_v58 }
 0xc43   :  { %v2194_v0 = vsel %vm2187_vm3, %v2190_v25, %v2193_v59  ;;  %v2299_v28 = vsel %vm2292_vm5, %v2295_v62, %v2298_v61 }
 0xc44   :  { %v2195_v1 = vsel %vm2185_vm6, nan, %v2194_v0  ;;  %v2300_v3 = vsel %vm2185_vm6, nan, %v2299_v28 }
 0xc71   :  { %v2088_v4 = vpop.permute.xlu1 %2087 }
 0xc72   :  { %v2090_v9 = vsel %vm2076_vm4, %v2088_v4, 0.0  ;;  %vm2322_vm4 = vcmask 130048  }
 0xc73   :  { %2091 = vadd.xlane.f32.xlu1 %v2090_v9 }
 0xd00   :  { %v2092_v10 = vpop.xlane.xlu1 %2091 }
 0xd01   :  { %v2196_v12 = vmul.f32 %v2195_v1, %v2092_v10 }
 0xd03   :  { %2302 = vrot.lane.b32.xlu0 %v2196_v12, %s3731_s26 }
 0xd07   :  { %2306 = vrot.lane.b32.xlu0 %v2300_v3, %s3732_s10 }
 0xd75   :  { %v2303_v13 = vpop.permute.xlu0 %2302 }
 0xd79   :  { %v2307_v14 = vpop.permute.xlu0 %2306 }
 0xd7a   :  { %v2310_v48 = vsel %vm2309_vm7, %v2303_v13, %v2307_v14 }
 0xd7b   :  { %v3125_v15 = vmul.f32 -1.442695, %v2310_v48 }
 0xd7d   :  { %3634 = vpow2.f32 %v3125_v15 }
 0xd87   :  { %v3635_v60 = vpop.eup %3634 }
 0xd88   :  { %v2314_v16 = vadd.f32 1.0, %v3635_v60 }
 0xd8a   :  { %3636 = vrcp.f32 %v2314_v16 }
 0xd94   :  { %v3637_v17 = vpop.eup %3636 }
 0xd95   :  { %2318 = vrot.lane.b32.xlu0 %v3637_v17, %s3733_s11 }
 0xe07   :  { %v2319_v54 = vpop.permute.xlu0 %2318 }
 0xe08   :  { %v2323_v19 = vsel %vm2322_vm4, %v2321_v18, %v2319_v54 }
 0xe09   :  { %v2325_v63 = vsel %vm2324_vm8, %v2323_v19, 0.0 }
 0xe0a   :  { %2326 = vst [vmem:[%s4283_s9] sm:$0xff] %v2325_v63 }
 0xe0b   :  { %3700 = dma.done.wait [#allocation3], 24576 }
 0xe0c   :  { %3701 = vsyncadd [#allocation3], 4294942720  ;;  %v2364_v20 = vpack.c.bf16 %v4173_v41, %v4173_v41  ;;  %v2332_v21 = vld [vmem:[#allocation2 + $0x8] sm:$0xff]  ;;  %v2331_v22 = vld [vmem:[#allocation2] sm:$0xff]  ;;  %v2363_v12 = vpack.c.bf16 %v4171_v40, %v4171_v40 }
 0xe0d   :  { %v2334_v2 = vld [vmem:[#allocation2 + $0x68] sm:$0xff]  ;;  %2378 = vmatprep.subr.bf16.mxu1 %v2332_v21  ;;  %v2333_v42 = vld [vmem:[#allocation2 + $0x60] sm:$0xff]  ;;  %v2434_v26 = vld [vmem:[#allocation2 + $0x18] sm:$0xff] }
 0xe0e   :  { %2410 = vmatprep.mubr.bf16.mxu1 %v2364_v20  ;;  %2379 = vmatpush1.bf16.msra.mxu1 %v2331_v22  ;;  %v2336_v11 = vld [vmem:[#allocation2 + $0xc8] sm:$0xff]  ;;  %v2335_v23 = vld [vmem:[#allocation2 + $0xc0] sm:$0xff]  ;;  %v2433_v29 = vld [vmem:[#allocation2 + $0x10] sm:$0xff] }
 0xe0f   :  { %2380 = vmatprep.subr.bf16.mxu1 %v2334_v2  ;;  %v2338_v24 = vld [vmem:[#allocation2 + $0x128] sm:$0xff]  ;;  %v2337_v27 = vld [vmem:[#allocation2 + $0x120] sm:$0xff]  ;;  %2480 = vmatprep.subr.bf16.mxu0 %v2434_v26  ;;  %v2436_v41 = vld [vmem:[#allocation2 + $0x78] sm:$0xff] }
 0xe10   :  { %v2340_v30 = vld [vmem:[#allocation2 + $0x188] sm:$0xff]  ;;  %2481 = vmatpush1.bf16.msra.mxu0 %v2433_v29  ;;  %v2435_v31 = vld [vmem:[#allocation2 + $0x70] sm:$0xff]  ;;  %v2438_v32 = vld [vmem:[#allocation2 + $0xd8] sm:$0xff] }
 0xe11   :  { %2482 = vmatprep.subr.bf16.mxu0 %v2436_v41  ;;  %v2339_v49 = vld [vmem:[#allocation2 + $0x180] sm:$0xff]  ;;  %v2342_v33 = vld [vmem:[#allocation2 + $0x1e8] sm:$0xff]  ;;  %v2437_v34 = vld [vmem:[#allocation2 + $0xd0] sm:$0xff] }
 0xe12   :  { %2381 = vmatpush1.bf16.msra.mxu1 %v2333_v42  ;;  %v2440_v35 = vld [vmem:[#allocation2 + $0x138] sm:$0xff]  ;;  %v2341_v36 = vld [vmem:[#allocation2 + $0x1e0] sm:$0xff]  ;;  %v2344_v37 = vld [vmem:[#allocation2 + $0x248] sm:$0xff] }
 0xe13   :  { %2382 = vmatprep.subr.bf16.mxu1 %v2336_v11  ;;  %v2439_v38 = vld [vmem:[#allocation2 + $0x130] sm:$0xff]  ;;  %v2442_v39 = vld [vmem:[#allocation2 + $0x198] sm:$0xff]  ;;  %v2343_v5 = vld [vmem:[#allocation2 + $0x240] sm:$0xff] }
 0xe14   :  { %2483 = vmatpush1.bf16.msra.mxu0 %v2435_v31  ;;  %v2346_v6 = vld [vmem:[#allocation2 + $0x2a8] sm:$0xff]  ;;  %v2441_v43 = vld [vmem:[#allocation2 + $0x190] sm:$0xff]  ;;  %v2444_v44 = vld [vmem:[#allocation2 + $0x1f8] sm:$0xff] }
 0xe15   :  { %2484 = vmatprep.subr.bf16.mxu0 %v2438_v32  ;;  %v2345_v45 = vld [vmem:[#allocation2 + $0x2a0] sm:$0xff]  ;;  %v2348_v46 = vld [vmem:[#allocation2 + $0x308] sm:$0xff]  ;;  %v2443_v47 = vld [vmem:[#allocation2 + $0x1f0] sm:$0xff] }
 0xe16   :  { %2383 = vmatpush1.bf16.msra.mxu1 %v2335_v23  ;;  %v2446_v50 = vld [vmem:[#allocation2 + $0x258] sm:$0xff]  ;;  %v2347_v7 = vld [vmem:[#allocation2 + $0x300] sm:$0xff]  ;;  %v2350_v8 = vld [vmem:[#allocation2 + $0x368] sm:$0xff] }
 0xe17   :  { %2384 = vmatprep.subr.bf16.mxu1 %v2338_v24  ;;  %v2445_v51 = vld [vmem:[#allocation2 + $0x250] sm:$0xff]  ;;  %v2448_v56 = vld [vmem:[#allocation2 + $0x2b8] sm:$0xff]  ;;  %v2349_v57 = vld [vmem:[#allocation2 + $0x360] sm:$0xff] }
 0xe18   :  { %2485 = vmatpush1.bf16.msra.mxu0 %v2437_v34  ;;  %v2352_v58 = vld [vmem:[#allocation2 + $0x3c8] sm:$0xff]  ;;  %v2351_v59 = vld [vmem:[#allocation2 + $0x3c0] sm:$0xff]  ;;  %v2447_v13 = vld [vmem:[#allocation2 + $0x2b0] sm:$0xff] }
 0xe19   :  { %2486 = vmatprep.subr.bf16.mxu0 %v2440_v35  ;;  %v2354_v61 = vld [vmem:[#allocation2 + $0x428] sm:$0xff]  ;;  %v2353_v25 = vld [vmem:[#allocation2 + $0x420] sm:$0xff]  ;;  %v2450_v14 = vld [vmem:[#allocation2 + $0x318] sm:$0xff] }
 0xe1a   :  { %2385 = vmatpush1.bf16.msra.mxu1 %v2337_v27  ;;  %v2356_v62 = vld [vmem:[#allocation2 + $0x488] sm:$0xff]  ;;  %v2355_v0 = vld [vmem:[#allocation2 + $0x480] sm:$0xff]  ;;  %v2449_v48 = vld [vmem:[#allocation2 + $0x310] sm:$0xff] }
 0xe1b   :  { %2386 = vmatprep.subr.bf16.mxu1 %v2340_v30  ;;  %v2358_v28 = vld [vmem:[#allocation2 + $0x4e8] sm:$0xff]  ;;  %v2357_v1 = vld [vmem:[#allocation2 + $0x4e0] sm:$0xff]  ;;  %v2452_v15 = vld [vmem:[#allocation2 + $0x378] sm:$0xff] }
 0xe1c   :  { %2487 = vmatpush1.bf16.msra.mxu0 %v2439_v38  ;;  %v2360_v3 = vld [vmem:[#allocation2 + $0x548] sm:$0xff]  ;;  %v2359_v4 = vld [vmem:[#allocation2 + $0x540] sm:$0xff]  ;;  %v2451_v60 = vld [vmem:[#allocation2 + $0x370] sm:$0xff] }
 0xe1d   :  { %2488 = vmatprep.subr.bf16.mxu0 %v2442_v39  ;;  %v2362_v9 = vld [vmem:[#allocation2 + $0x5a8] sm:$0xff]  ;;  %v2361_v10 = vld [vmem:[#allocation2 + $0x5a0] sm:$0xff]  ;;  %v2454_v16 = vld [vmem:[#allocation2 + $0x3d8] sm:$0xff] }
 0xe1e   :  { %2387 = vmatpush1.bf16.msra.mxu1 %v2339_v49  ;;  %v2453_v17 = vld [vmem:[#allocation2 + $0x3d0] sm:$0xff]  ;;  %v2456_v18 = vld [vmem:[#allocation2 + $0x438] sm:$0xff]  ;;  %v2536_v11 = vld [vmem:[#allocation2 + $0x28] sm:$0xff] }
 0xe1f   :  { %2388 = vmatprep.subr.bf16.mxu1 %v2342_v33  ;;  %v2455_v54 = vld [vmem:[#allocation2 + $0x430] sm:$0xff]  ;;  %v2458_v40 = vld [vmem:[#allocation2 + $0x498] sm:$0xff]  ;;  %v2535_v24 = vld [vmem:[#allocation2 + $0x20] sm:$0xff] }
 0xe20   :  { %2489 = vmatpush1.bf16.msra.mxu0 %v2441_v43  ;;  %v2457_v19 = vld [vmem:[#allocation2 + $0x490] sm:$0xff]  ;;  %v2460_v63 = vld [vmem:[#allocation2 + $0x4f8] sm:$0xff]  ;;  %v2544_v26 = vld [vmem:[#allocation2 + $0x88] sm:$0xff] }
 0xe21   :  { %2490 = vmatprep.subr.bf16.mxu0 %v2444_v44  ;;  %v2459_v20 = vld [vmem:[#allocation2 + $0x4f0] sm:$0xff]  ;;  %v2462_v21 = vld [vmem:[#allocation2 + $0x558] sm:$0xff]  ;;  %v2543_v27 = vld [vmem:[#allocation2 + $0x80] sm:$0xff] }
 0xe22   :  { %2389 = vmatpush1.bf16.msra.mxu1 %v2341_v36  ;;  %v2461_v22 = vld [vmem:[#allocation2 + $0x550] sm:$0xff]  ;;  %v2464_v2 = vld [vmem:[#allocation2 + $0x5b8] sm:$0xff]  ;;  %v2552_v29 = vld [vmem:[#allocation2 + $0xe8] sm:$0xff] }
 0xe23   :  { %2390 = vmatprep.subr.bf16.mxu1 %v2344_v37  ;;  %v2463_v42 = vld [vmem:[#allocation2 + $0x5b0] sm:$0xff]  ;;  %v2538_v23 = vld [vmem:[#allocation2 + $0x38] sm:$0xff]  ;;  %v2551_v41 = vld [vmem:[#allocation2 + $0xe0] sm:$0xff] }
 0xe24   :  { %2491 = vmatpush1.bf16.msra.mxu0 %v2443_v47  ;;  %v2560_v30 = vld [vmem:[#allocation2 + $0x148] sm:$0xff]  ;;  %v2559_v31 = vld [vmem:[#allocation2 + $0x140] sm:$0xff] }
 0xe25   :  { %2492 = vmatprep.subr.bf16.mxu0 %v2446_v50  ;;  %v2568_v32 = vld [vmem:[#allocation2 + $0x1a8] sm:$0xff]  ;;  %v2567_v49 = vld [vmem:[#allocation2 + $0x1a0] sm:$0xff] }
 0xe26   :  { %2391 = vmatpush1.bf16.msra.mxu1 %v2343_v5  ;;  %v2576_v33 = vld [vmem:[#allocation2 + $0x208] sm:$0xff]  ;;  %v2575_v34 = vld [vmem:[#allocation2 + $0x200] sm:$0xff] }
 0xe27   :  { %2392 = vmatprep.subr.bf16.mxu1 %v2346_v6  ;;  %v2584_v35 = vld [vmem:[#allocation2 + $0x268] sm:$0xff]  ;;  %v2583_v36 = vld [vmem:[#allocation2 + $0x260] sm:$0xff] }
 0xe28   :  { %2493 = vmatpush1.bf16.msra.mxu0 %v2445_v51  ;;  %v2592_v37 = vld [vmem:[#allocation2 + $0x2c8] sm:$0xff]  ;;  %v2591_v38 = vld [vmem:[#allocation2 + $0x2c0] sm:$0xff] }
 0xe29   :  { %2494 = vmatprep.subr.bf16.mxu0 %v2448_v56  ;;  %v3126_v39 = vld [vmem:[%s4279_s5 + $0x7] ss:$8 sm:$0x3] }
 0xe2a   :  { %2393 = vmatpush1.bf16.msra.mxu1 %v2345_v45  ;;  %v2371_v5 = vrot.slane %v3126_v39, %v3933_v53  ;;  %v2375_v6 = vrot.slane %v3126_v39, %v3939_v55  ;;  %v2650_v39 = vld [vmem:[#allocation2 + $0x578] sm:$0xff] }
 0xe2b   :  { %2394 = vmatprep.subr.bf16.mxu1 %v2348_v46 }
 0xe2c   :  { %2495 = vmatpush1.bf16.msra.mxu0 %v2447_v13  ;;  %v2561_v13 = vld [vmem:[#allocation2 + $0x150] sm:$0xff] }
 0xe2d   :  { %2496 = vmatprep.subr.bf16.mxu0 %v2450_v14  ;;  %v2570_v14 = vld [vmem:[#allocation2 + $0x1b8] sm:$0xff] }
 0xe2e   :  { %2395 = vmatpush1.bf16.msra.mxu1 %v2347_v7 }
 0xe2f   :  { %2396 = vmatprep.subr.bf16.mxu1 %v2350_v8 }
 0xe30   :  { %2497 = vmatpush1.bf16.msra.mxu0 %v2449_v48  ;;  %v2569_v48 = vld [vmem:[#allocation2 + $0x1b0] sm:$0xff] }
 0xe31   :  { %2498 = vmatprep.subr.bf16.mxu0 %v2452_v15  ;;  %v2578_v15 = vld [vmem:[#allocation2 + $0x218] sm:$0xff] }
 0xe32   :  { %2397 = vmatpush1.bf16.msra.mxu1 %v2349_v57 }
 0xe33   :  { %2398 = vmatprep.subr.bf16.mxu1 %v2352_v58 }
 0xe34   :  { %2499 = vmatpush1.bf16.msra.mxu0 %v2451_v60  ;;  %v2577_v60 = vld [vmem:[#allocation2 + $0x210] sm:$0xff] }
 0xe35   :  { %2500 = vmatprep.subr.bf16.mxu0 %v2454_v16  ;;  %v2586_v16 = vld [vmem:[#allocation2 + $0x278] sm:$0xff] }
 0xe36   :  { %2399 = vmatpush1.bf16.msra.mxu1 %v2351_v59 }
 0xe37   :  { %2400 = vmatprep.subr.bf16.mxu1 %v2354_v61 }
 0xe38   :  { %2501 = vmatpush1.bf16.msra.mxu0 %v2453_v17  ;;  %v2585_v17 = vld [vmem:[#allocation2 + $0x270] sm:$0xff] }
 0xe39   :  { %2502 = vmatprep.subr.bf16.mxu0 %v2456_v18  ;;  %v2594_v18 = vld [vmem:[#allocation2 + $0x2d8] sm:$0xff] }
 0xe3a   :  { %2401 = vmatpush1.bf16.msra.mxu1 %v2353_v25 }
 0xe3b   :  { %2402 = vmatprep.subr.bf16.mxu1 %v2356_v62 }
 0xe3c   :  { %2503 = vmatpush1.bf16.msra.mxu0 %v2455_v54  ;;  %v2593_v54 = vld [vmem:[#allocation2 + $0x2d0] sm:$0xff] }
 0xe3d   :  { %2504 = vmatprep.subr.bf16.mxu0 %v2458_v40  ;;  %v2600_v40 = vld [vmem:[#allocation2 + $0x328] sm:$0xff] }
 0xe3e   :  { %2403 = vmatpush1.bf16.msra.mxu1 %v2355_v0 }
 0xe3f   :  { %2404 = vmatprep.subr.bf16.mxu1 %v2358_v28 }
 0xe40   :  { %2505 = vmatpush1.bf16.msra.mxu0 %v2457_v19  ;;  %v2602_v19 = vld [vmem:[#allocation2 + $0x338] sm:$0xff] }
 0xe41   :  { %2506 = vmatprep.subr.bf16.mxu0 %v2460_v63  ;;  %v2599_v63 = vld [vmem:[#allocation2 + $0x320] sm:$0xff] }
 0xe42   :  { %2405 = vmatpush1.bf16.msra.mxu1 %v2357_v1  ;;  %v2537_v1 = vld [vmem:[#allocation2 + $0x30] sm:$0xff] }
 0xe43   :  { %2406 = vmatprep.subr.bf16.mxu1 %v2360_v3  ;;  %v2546_v3 = vld [vmem:[#allocation2 + $0x98] sm:$0xff] }
 0xe44   :  { %2507 = vmatpush1.bf16.msra.mxu0 %v2459_v20  ;;  %v2601_v20 = vld [vmem:[#allocation2 + $0x330] sm:$0xff] }
 0xe45   :  { %2508 = vmatprep.subr.bf16.mxu0 %v2462_v21  ;;  %v2608_v21 = vld [vmem:[#allocation2 + $0x388] sm:$0xff] }
 0xe46   :  { %2407 = vmatpush1.bf16.msra.mxu1 %v2359_v4  ;;  %v2545_v4 = vld [vmem:[#allocation2 + $0x90] sm:$0xff] }
 0xe47   :  { %2408 = vmatprep.subr.bf16.mxu1 %v2362_v9  ;;  %v2554_v9 = vld [vmem:[#allocation2 + $0xf8] sm:$0xff] }
 0xe48   :  { %2509 = vmatpush1.bf16.msra.mxu0 %v2461_v22  ;;  %v2610_v22 = vld [vmem:[#allocation2 + $0x398] sm:$0xff] }
 0xe49   :  { %2510 = vmatprep.subr.bf16.mxu0 %v2464_v2  ;;  %v2607_v2 = vld [vmem:[#allocation2 + $0x380] sm:$0xff] }
 0xe4a   :  { %2409 = vmatpush1.bf16.msra.mxu1 %v2361_v10  ;;  %v2553_v10 = vld [vmem:[#allocation2 + $0xf0] sm:$0xff] }
 0xe4b   :  { %2707 = vmatprep.subr.bf16.mxu1 %v2536_v11  ;;  %v2616_v11 = vld [vmem:[#allocation2 + $0x3e8] sm:$0xff] }
 0xe4c   :  { %2511 = vmatpush1.bf16.msra.mxu0 %v2463_v42  ;;  %v2609_v42 = vld [vmem:[#allocation2 + $0x390] sm:$0xff] }
 0xe4d   :  { %2411 = vmatmul.mubr.bf16.vlgmr.msra.gmra.mrb[36].mxu1 %v2363_v12  ;;  %2748 = vmatprep.subr.bf16.mxu0 %v2538_v23  ;;  %v2562_v12 = vld [vmem:[#allocation2 + $0x158] sm:$0xff] }
 0xe4e   :  { %2708 = vmatpush1.bf16.msra.mxu1 %v2535_v24  ;;  %v2618_v23 = vld [vmem:[#allocation2 + $0x3f8] sm:$0xff]  ;;  %v2615_v24 = vld [vmem:[#allocation2 + $0x3e0] sm:$0xff] }
 0xe4f   :  { %2709 = vmatprep.subr.bf16.mxu1 %v2544_v26  ;;  %v2617_v26 = vld [vmem:[#allocation2 + $0x3f0] sm:$0xff] }
 0xe52   :  { %2710 = vmatpush1.bf16.msra.mxu1 %v2543_v27  ;;  %v2624_v27 = vld [vmem:[#allocation2 + $0x448] sm:$0xff] }
 0xe53   :  { %2711 = vmatprep.subr.bf16.mxu1 %v2552_v29  ;;  %v2626_v29 = vld [vmem:[#allocation2 + $0x458] sm:$0xff] }
 0xe56   :  { %2712 = vmatpush1.bf16.msra.mxu1 %v2551_v41  ;;  %v2623_v41 = vld [vmem:[#allocation2 + $0x440] sm:$0xff] }
 0xe57   :  { %2713 = vmatprep.subr.bf16.mxu1 %v2560_v30  ;;  %v2625_v30 = vld [vmem:[#allocation2 + $0x450] sm:$0xff] }
 0xe5a   :  { %2714 = vmatpush1.bf16.msra.mxu1 %v2559_v31  ;;  %v2632_v31 = vld [vmem:[#allocation2 + $0x4a8] sm:$0xff] }
 0xe5b   :  { %2715 = vmatprep.subr.bf16.mxu1 %v2568_v32  ;;  %v2634_v32 = vld [vmem:[#allocation2 + $0x4b8] sm:$0xff] }
 0xe5e   :  { %2716 = vmatpush1.bf16.msra.mxu1 %v2567_v49  ;;  %v2631_v49 = vld [vmem:[#allocation2 + $0x4a0] sm:$0xff] }
 0xe5f   :  { %2717 = vmatprep.subr.bf16.mxu1 %v2576_v33  ;;  %v2633_v33 = vld [vmem:[#allocation2 + $0x4b0] sm:$0xff] }
 0xe62   :  { %2718 = vmatpush1.bf16.msra.mxu1 %v2575_v34  ;;  %v2640_v34 = vld [vmem:[#allocation2 + $0x508] sm:$0xff] }
 0xe63   :  { %2719 = vmatprep.subr.bf16.mxu1 %v2584_v35  ;;  %v2642_v35 = vld [vmem:[#allocation2 + $0x518] sm:$0xff] }
 0xe66   :  { %2720 = vmatpush1.bf16.msra.mxu1 %v2583_v36  ;;  %v2639_v36 = vld [vmem:[#allocation2 + $0x500] sm:$0xff] }
 0xe67   :  { %2721 = vmatprep.subr.bf16.mxu1 %v2592_v37  ;;  %v2641_v37 = vld [vmem:[#allocation2 + $0x510] sm:$0xff] }
 0xe6a   :  { %2722 = vmatpush1.bf16.msra.mxu1 %v2591_v38  ;;  %v2648_v38 = vld [vmem:[#allocation2 + $0x568] sm:$0xff] }
 0xe6b   :  { %2723 = vmatprep.subr.bf16.mxu1 %v2600_v40  ;;  %v2556_v40 = vld [vmem:[#allocation2 + $0x108] sm:$0xff] }
 0xe6e   :  { %2724 = vmatpush1.bf16.msra.mxu1 %v2599_v63  ;;  %v2555_v63 = vld [vmem:[#allocation2 + $0x100] sm:$0xff] }
 0xe6f   :  { %2725 = vmatprep.subr.bf16.mxu1 %v2608_v21  ;;  %v2564_v21 = vld [vmem:[#allocation2 + $0x168] sm:$0xff] }
 0xe72   :  { %2726 = vmatpush1.bf16.msra.mxu1 %v2607_v2  ;;  %v2563_v2 = vld [vmem:[#allocation2 + $0x160] sm:$0xff] }
 0xe73   :  { %2727 = vmatprep.subr.bf16.mxu1 %v2616_v11  ;;  %v2572_v11 = vld [vmem:[#allocation2 + $0x1c8] sm:$0xff] }
 0xe76   :  { %2728 = vmatpush1.bf16.msra.mxu1 %v2615_v24  ;;  %v2571_v24 = vld [vmem:[#allocation2 + $0x1c0] sm:$0xff] }
 0xe77   :  { %2729 = vmatprep.subr.bf16.mxu1 %v2624_v27  ;;  %v2580_v27 = vld [vmem:[#allocation2 + $0x228] sm:$0xff] }
 0xe7a   :  { %2730 = vmatpush1.bf16.msra.mxu1 %v2623_v41  ;;  %v2579_v41 = vld [vmem:[#allocation2 + $0x220] sm:$0xff] }
 0xe7b   :  { %2731 = vmatprep.subr.bf16.mxu1 %v2632_v31  ;;  %v2588_v31 = vld [vmem:[#allocation2 + $0x288] sm:$0xff] }
 0xe7e   :  { %2732 = vmatpush1.bf16.msra.mxu1 %v2631_v49  ;;  %v2587_v49 = vld [vmem:[#allocation2 + $0x280] sm:$0xff] }
 0xe7f   :  { %2733 = vmatprep.subr.bf16.mxu1 %v2640_v34  ;;  %v2596_v34 = vld [vmem:[#allocation2 + $0x2e8] sm:$0xff] }
 0xe82   :  { %2734 = vmatpush1.bf16.msra.mxu1 %v2639_v36  ;;  %v2595_v36 = vld [vmem:[#allocation2 + $0x2e0] sm:$0xff] }
 0xe83   :  { %2735 = vmatprep.subr.bf16.mxu1 %v2648_v38  ;;  %v2604_v38 = vld [vmem:[#allocation2 + $0x348] sm:$0xff] }
 0xf20   :  { %v2412_v43 = vpop.f32.mrb[36].mxu1 }
 0xf21   :  { %v2413_v44 = vadd.f32 %v2412_v43, %v2371_v5  ;;  %v2414_v45 = vpop.f32.mrb[37].mxu1  ;;  %v2647_v5 = vld [vmem:[#allocation2 + $0x560] sm:$0xff]  ;;  %v2656_v43 = vld [vmem:[#allocation2 + $0x5c8] sm:$0xff] }
 0xf22   :  { %v2415_v46 = vadd.f32 %v2414_v45, %v2375_v6  ;;  %v2416_v47 = vpop.f32.mrb[38].mxu1  ;;  %v2649_v6 = vld [vmem:[#allocation2 + $0x570] sm:$0xff]  ;;  %2736 = vmatpush1.bf16.msra.mxu1 %v2647_v5  ;;  %v2655_v45 = vld [vmem:[#allocation2 + $0x5c0] sm:$0xff] }
 0xf23   :  { %v3127_v50 = vmul.f32 -1.442695, %v2413_v44  ;;  %v2417_v7 = vpop.f32.mrb[39].mxu1  ;;  %2737 = vmatprep.subr.bf16.mxu1 %v2656_v43  ;;  %v2540_v47 = vld [vmem:[#allocation2 + $0x48] sm:$0xff]  ;;  %v2603_v5 = vld [vmem:[#allocation2 + $0x340] sm:$0xff] }
 0xf24   :  { %v3128_v8 = vmul.f32 -1.442695, %v2415_v46  ;;  %v3129_v7 = vld [vmem:[%s4279_s5 + $0x10] ss:$8 sm:$0x3]  ;;  %v2612_v43 = vld [vmem:[#allocation2 + $0x3a8] sm:$0xff] }
 0xf25   :  { %3638 = vpow2.f32 %v3127_v50  ;;  %v2542_v50 = vld [vmem:[#allocation2 + $0x58] sm:$0xff] }
 0xf26   :  { %3640 = vpow2.f32 %v3128_v8  ;;  %2738 = vmatpush1.bf16.msra.mxu1 %v2655_v45  ;;  %v2473_v8 = vrot.slane %v3129_v7, %v3933_v53  ;;  %v2611_v45 = vld [vmem:[#allocation2 + $0x3a0] sm:$0xff] }
 0xf27   :  { %2789 = vmatprep.subr.bf16.mxu1 %v2540_v47  ;;  %v2620_v47 = vld [vmem:[#allocation2 + $0x408] sm:$0xff] }
 0xf2f   :  { %v3639_v51 = vpop.eup %3638 }
 0xf30   :  { %v3641_v56 = vpop.eup %3640  ;;  %v2425_v57 = vadd.f32 1.0, %v3639_v51  ;;  %v2477_v51 = vrot.slane %v3129_v7, %v3939_v55  ;;  %v2619_v7 = vld [vmem:[#allocation2 + $0x400] sm:$0xff] }
 0xf31   :  { %v2426_v58 = vadd.f32 1.0, %v3641_v56 }
 0xf32   :  { %3642 = vrcp.f32 %v2425_v57 }
 0xf33   :  { %3644 = vrcp.f32 %v2426_v58 }
 0xf3c   :  { %v3643_v59 = vpop.eup %3642 }
 0xf3d   :  { %v3645_v61 = vpop.eup %3644  ;;  %v2431_v25 = vmul.f32 %v3643_v59, %v2413_v44  ;;  %v2658_v44 = vld [vmem:[#allocation2 + $0x5d8] sm:$0xff] }
 0xf3e   :  { %v2432_v62 = vmul.f32 %v3645_v61, %v2415_v46  ;;  %v2657_v46 = vld [vmem:[#allocation2 + $0x5d0] sm:$0xff] }
 0xf3f   :  { %v2465_v28 = vpack.c.bf16 %v2431_v25, %v2431_v25 }
 0xf40   :  { %v2466_v0 = vpack.c.bf16 %v2432_v62, %v2432_v62 }
 0xf42   :  { %2512 = vmatprep.mubr.bf16.mxu0 %v2466_v0 }
 0xf43   :  { %2513 = vmatmul.mubr.bf16.vlgmr.msra.gmra.mrb[4].mxu0 %v2465_v28 }
 0xf44   :  { %2749 = vmatpush1.bf16.msra.mxu0 %v2537_v1 }
 0xf45   :  { %2750 = vmatprep.subr.bf16.mxu0 %v2546_v3 }
 0xf48   :  { %2751 = vmatpush1.bf16.msra.mxu0 %v2545_v4 }
 0xf49   :  { %2752 = vmatprep.subr.bf16.mxu0 %v2554_v9 }
 0xf4c   :  { %2753 = vmatpush1.bf16.msra.mxu0 %v2553_v10 }
 0xf4d   :  { %2754 = vmatprep.subr.bf16.mxu0 %v2562_v12 }
 0xf50   :  { %2755 = vmatpush1.bf16.msra.mxu0 %v2561_v13 }
 0xf51   :  { %2756 = vmatprep.subr.bf16.mxu0 %v2570_v14 }
 0xf54   :  { %2757 = vmatpush1.bf16.msra.mxu0 %v2569_v48 }
 0xf55   :  { %2758 = vmatprep.subr.bf16.mxu0 %v2578_v15  ;;  %v2539_v15 = vld [vmem:[#allocation2 + $0x40] sm:$0xff] }
 0xf58   :  { %2759 = vmatpush1.bf16.msra.mxu0 %v2577_v60  ;;  %v2541_v60 = vld [vmem:[#allocation2 + $0x50] sm:$0xff] }
 0xf59   :  { %2760 = vmatprep.subr.bf16.mxu0 %v2586_v16  ;;  %v2548_v16 = vld [vmem:[#allocation2 + $0xa8] sm:$0xff] }
 0xf5c   :  { %2761 = vmatpush1.bf16.msra.mxu0 %v2585_v17  ;;  %v2550_v17 = vld [vmem:[#allocation2 + $0xb8] sm:$0xff] }
 0xf5d   :  { %2762 = vmatprep.subr.bf16.mxu0 %v2594_v18  ;;  %v2547_v18 = vld [vmem:[#allocation2 + $0xa0] sm:$0xff] }
 0xf60   :  { %2763 = vmatpush1.bf16.msra.mxu0 %v2593_v54  ;;  %v2549_v54 = vld [vmem:[#allocation2 + $0xb0] sm:$0xff] }
 0xf61   :  { %2764 = vmatprep.subr.bf16.mxu0 %v2602_v19  ;;  %v2558_v19 = vld [vmem:[#allocation2 + $0x118] sm:$0xff] }
 0xf64   :  { %2765 = vmatpush1.bf16.msra.mxu0 %v2601_v20  ;;  %v2557_v20 = vld [vmem:[#allocation2 + $0x110] sm:$0xff] }
 0xf65   :  { %2766 = vmatprep.subr.bf16.mxu0 %v2610_v22  ;;  %v2566_v22 = vld [vmem:[#allocation2 + $0x178] sm:$0xff] }
 0xf68   :  { %2767 = vmatpush1.bf16.msra.mxu0 %v2609_v42  ;;  %v2565_v42 = vld [vmem:[#allocation2 + $0x170] sm:$0xff] }
 0xf69   :  { %2768 = vmatprep.subr.bf16.mxu0 %v2618_v23  ;;  %v2574_v23 = vld [vmem:[#allocation2 + $0x1d8] sm:$0xff] }
 0xf6c   :  { %2769 = vmatpush1.bf16.msra.mxu0 %v2617_v26  ;;  %v2573_v26 = vld [vmem:[#allocation2 + $0x1d0] sm:$0xff] }
 0xf6d   :  { %2770 = vmatprep.subr.bf16.mxu0 %v2626_v29  ;;  %v2582_v29 = vld [vmem:[#allocation2 + $0x238] sm:$0xff] }
 0xf70   :  { %2771 = vmatpush1.bf16.msra.mxu0 %v2625_v30  ;;  %v2581_v30 = vld [vmem:[#allocation2 + $0x230] sm:$0xff] }
 0xf71   :  { %2772 = vmatprep.subr.bf16.mxu0 %v2634_v32  ;;  %v2590_v32 = vld [vmem:[#allocation2 + $0x298] sm:$0xff] }
 0xf74   :  { %2773 = vmatpush1.bf16.msra.mxu0 %v2633_v33  ;;  %v2589_v33 = vld [vmem:[#allocation2 + $0x290] sm:$0xff] }
 0xf75   :  { %2774 = vmatprep.subr.bf16.mxu0 %v2642_v35  ;;  %v2598_v35 = vld [vmem:[#allocation2 + $0x2f8] sm:$0xff] }
 0xf78   :  { %2775 = vmatpush1.bf16.msra.mxu0 %v2641_v37  ;;  %v2597_v37 = vld [vmem:[#allocation2 + $0x2f0] sm:$0xff] }
 0xf79   :  { %2776 = vmatprep.subr.bf16.mxu0 %v2650_v39  ;;  %v2606_v39 = vld [vmem:[#allocation2 + $0x358] sm:$0xff] }
 0xf7c   :  { %2777 = vmatpush1.bf16.msra.mxu0 %v2649_v6  ;;  %v2605_v6 = vld [vmem:[#allocation2 + $0x350] sm:$0xff] }
 0xf7d   :  { %2778 = vmatprep.subr.bf16.mxu0 %v2658_v44  ;;  %v2614_v44 = vld [vmem:[#allocation2 + $0x3b8] sm:$0xff] }
 0xf80   :  { %2779 = vmatpush1.bf16.msra.mxu0 %v2657_v46  ;;  %v2613_v46 = vld [vmem:[#allocation2 + $0x3b0] sm:$0xff] }
 0xf81   :  { %2830 = vmatprep.subr.bf16.mxu0 %v2542_v50  ;;  %v2622_v50 = vld [vmem:[#allocation2 + $0x418] sm:$0xff] }
0x1016   :  { %v2514_v56 = vpop.f32.mrb[4].mxu0 }
0x1017   :  { %v2515_v57 = vadd.f32 %v2514_v56, %v2473_v8  ;;  %v2516_v58 = vpop.f32.mrb[5].mxu0  ;;  %v2621_v8 = vld [vmem:[#allocation2 + $0x410] sm:$0xff]  ;;  %v2630_v56 = vld [vmem:[#allocation2 + $0x478] sm:$0xff] }
0x1018   :  { %v2517_v59 = vadd.f32 %v2516_v58, %v2477_v51  ;;  %v2518_v61 = vpop.f32.mrb[6].mxu0  ;;  %v2628_v51 = vld [vmem:[#allocation2 + $0x468] sm:$0xff]  ;;  %v2629_v58 = vld [vmem:[#allocation2 + $0x470] sm:$0xff] }
0x1019   :  { %v3130_v25 = vmul.f32 -1.442695, %v2515_v57  ;;  %v2519_v62 = vpop.f32.mrb[7].mxu0  ;;  %v2638_v61 = vld [vmem:[#allocation2 + $0x4d8] sm:$0xff] }
0x101a   :  { %v3131_v0 = vmul.f32 -1.442695, %v2517_v59  ;;  %v2637_v62 = vld [vmem:[#allocation2 + $0x4d0] sm:$0xff] }
0x101b   :  { %3646 = vpow2.f32 %v3130_v25  ;;  %v2635_v25 = vld [vmem:[#allocation2 + $0x4c0] sm:$0xff] }
0x101c   :  { %3648 = vpow2.f32 %v3131_v0  ;;  %v2644_v0 = vld [vmem:[#allocation2 + $0x528] sm:$0xff] }
0x1025   :  { %v3647_v28 = vpop.eup %3646 }
0x1026   :  { %v3649_v1 = vpop.eup %3648  ;;  %v2527_v3 = vadd.f32 1.0, %v3647_v28  ;;  %v2646_v28 = vld [vmem:[#allocation2 + $0x538] sm:$0xff] }
0x1027   :  { %v2528_v4 = vadd.f32 1.0, %v3649_v1  ;;  %v2643_v1 = vld [vmem:[#allocation2 + $0x520] sm:$0xff] }
0x1028   :  { %3650 = vrcp.f32 %v2527_v3  ;;  %v2645_v3 = vld [vmem:[#allocation2 + $0x530] sm:$0xff] }
0x1029   :  { %3652 = vrcp.f32 %v2528_v4  ;;  %v2652_v4 = vld [vmem:[#allocation2 + $0x588] sm:$0xff] }
0x1032   :  { %v3651_v9 = vpop.eup %3650 }
0x1033   :  { %v3653_v10 = vpop.eup %3652  ;;  %v2533_v12 = vmul.f32 %v3651_v9, %v2515_v57  ;;  %v2627_v57 = vld [vmem:[#allocation2 + $0x460] sm:$0xff]  ;;  %v2654_v9 = vld [vmem:[#allocation2 + $0x598] sm:$0xff] }
0x1034   :  { %v2534_v13 = vmul.f32 %v3653_v10, %v2517_v59  ;;  %v2636_v59 = vld [vmem:[#allocation2 + $0x4c8] sm:$0xff]  ;;  %v2651_v10 = vld [vmem:[#allocation2 + $0x580] sm:$0xff] }
0x1035   :  { %v4245_v48 = vpack.c.bf16 %v2533_v12, %v2533_v12  ;;  %v2653_v12 = vld [vmem:[#allocation2 + $0x590] sm:$0xff] }
0x1036   :  { %v2664_v14 = vpack.c.bf16 %v2534_v13, %v2534_v13  ;;  %v2660_v13 = vld [vmem:[#allocation2 + $0x5e8] sm:$0xff] }
0x1038   :  { %2739 = vmatprep.mubr.bf16.mxu1 %v2664_v14  ;;  %2780 = vmatprep.mubr.bf16.mxu0 %v2664_v14 }
0x1039   :  { %2740 = vmatmul.mubr.bf16.vlgmr.msra.gmra.mrb[40].mxu1 %v4245_v48  ;;  %2781 = vmatmul.mubr.bf16.vlgmr.msra.gmra.mrb[8].mxu0 %v4245_v48 }
0x103a   :  { %2790 = vmatpush1.bf16.msra.mxu1 %v2539_v15  ;;  %2831 = vmatpush1.bf16.msra.mxu0 %v2541_v60  ;;  %v2659_v15 = vld [vmem:[#allocation2 + $0x5e0] sm:$0xff]  ;;  %v2661_v60 = vld [vmem:[#allocation2 + $0x5f0] sm:$0xff] }
0x103b   :  { %2821 = vmatprep.mubr.bf16.mxu1 %v2664_v14  ;;  %2862 = vmatprep.mubr.bf16.mxu0 %v2664_v14  ;;  %v2662_v14 = vld [vmem:[#allocation2 + $0x5f8] sm:$0xff] }
0x103c   :  { %2791 = vmatprep.subr.bf16.mxu1 %v2548_v16  ;;  %2832 = vmatprep.subr.bf16.mxu0 %v2550_v17  ;;  %v2677_v16 = vsub.s32 2, %v3930_v52  ;;  %v2665_v17 = vld [vmem:[%s4280_s6] sm:$0xff]  ;;  %s3734_s6 = smov [#allocation7]  }
0x103d   :  { %s2885_s17 = sshll.u32 %s3734_s6, 4  ;;  %s2886_s17 = int_to_ptr.vmem [resolvable:$true] %s2885_s17 }
0x103e   :  { %2792 = vmatpush1.bf16.msra.mxu1 %v2547_v18  ;;  %2833 = vmatpush1.bf16.msra.mxu0 %v2549_v54  ;;  %v2681_v18 = vsub.s32 3, %v3930_v52  ;;  %v2670_v54 = vrot.slane %v2665_v17, %v3933_v53  ;;  %v2685_v53 = vsub.s32 4, %v3930_v52  ;;  %s3676_s3 = scalar_lea.vmem %s2886_s17, 1024  ;;  %p3681_p9 = scmp.lt.s32.totalorder %s2886_s17, %s2886_s17 }
0x103f   :  { %2793 = vmatprep.subr.bf16.mxu1 %v2556_v40  ;;  %2834 = vmatprep.subr.bf16.mxu0 %v2558_v19  ;;  %v2678_v40 = vrot.slane %v2665_v17, %v2677_v16  ;;  %v2674_v19 = vrot.slane %v2665_v17, %v3939_v55  ;;  %v2693_v55 = vsub.s32 6, %v3930_v52  ;;  %p3677_p8 = scmp.ne.s32.totalorder %s2886_s17, %s3676_s3  ;;  %p3682_p10 = scmp.lt.s32.totalorder %s3676_s3, %s3676_s3 }
0x1041   :  { %p3683_p11 = por %p3682_p10, %p3681_p9 }
0x1042   :  { %2794 = vmatpush1.bf16.msra.mxu1 %v2555_v63  ;;  %2835 = vmatpush1.bf16.msra.mxu0 %v2557_v20  ;;  %v2682_v63 = vrot.slane %v2665_v17, %v2681_v18 }
0x1043   :  { %2795 = vmatprep.subr.bf16.mxu1 %v2564_v21  ;;  %2836 = vmatprep.subr.bf16.mxu0 %v2566_v22  ;;  %p3684_p12 = pnand %p3683_p11, %p3677_p8 }
0x1046   :  { %2796 = vmatpush1.bf16.msra.mxu1 %v2563_v2  ;;  %2837 = vmatpush1.bf16.msra.mxu0 %v2565_v42 }
0x1047   :  { %2797 = vmatprep.subr.bf16.mxu1 %v2572_v11  ;;  %2838 = vmatprep.subr.bf16.mxu0 %v2574_v23 }
0x104a   :  { %2798 = vmatpush1.bf16.msra.mxu1 %v2571_v24  ;;  %2839 = vmatpush1.bf16.msra.mxu0 %v2573_v26 }
0x104b   :  { %2799 = vmatprep.subr.bf16.mxu1 %v2580_v27  ;;  %2840 = vmatprep.subr.bf16.mxu0 %v2582_v29 }
0x104e   :  { %2800 = vmatpush1.bf16.msra.mxu1 %v2579_v41  ;;  %2841 = vmatpush1.bf16.msra.mxu0 %v2581_v30  ;;  %v2689_v41 = vsub.s32 5, %v3930_v52  ;;  %v2697_v30 = vsub.s32 7, %v3930_v52 }
0x104f   :  { %2801 = vmatprep.subr.bf16.mxu1 %v2588_v31  ;;  %2842 = vmatprep.subr.bf16.mxu0 %v2590_v32  ;;  %v2686_v31 = vrot.slane %v2665_v17, %v2685_v53  ;;  %v2694_v32 = vrot.slane %v2665_v17, %v2693_v55 }
0x1052   :  { %2802 = vmatpush1.bf16.msra.mxu1 %v2587_v49  ;;  %2843 = vmatpush1.bf16.msra.mxu0 %v2589_v33  ;;  %v2690_v49 = vrot.slane %v2665_v17, %v2689_v41  ;;  %v2698_v33 = vrot.slane %v2665_v17, %v2697_v30 }
0x1053   :  { %2803 = vmatprep.subr.bf16.mxu1 %v2596_v34  ;;  %2844 = vmatprep.subr.bf16.mxu0 %v2598_v35 }
0x1056   :  { %2804 = vmatpush1.bf16.msra.mxu1 %v2595_v36  ;;  %2845 = vmatpush1.bf16.msra.mxu0 %v2597_v37 }
0x1057   :  { %2805 = vmatprep.subr.bf16.mxu1 %v2604_v38  ;;  %2846 = vmatprep.subr.bf16.mxu0 %v2606_v39 }
0x105a   :  { %2806 = vmatpush1.bf16.msra.mxu1 %v2603_v5  ;;  %2847 = vmatpush1.bf16.msra.mxu0 %v2605_v6 }
0x105b   :  { %2807 = vmatprep.subr.bf16.mxu1 %v2612_v43  ;;  %2848 = vmatprep.subr.bf16.mxu0 %v2614_v44 }
0x105e   :  { %2808 = vmatpush1.bf16.msra.mxu1 %v2611_v45  ;;  %2849 = vmatpush1.bf16.msra.mxu0 %v2613_v46 }
0x105f   :  { %2809 = vmatprep.subr.bf16.mxu1 %v2620_v47  ;;  %2850 = vmatprep.subr.bf16.mxu0 %v2622_v50 }
0x1062   :  { %2810 = vmatpush1.bf16.msra.mxu1 %v2619_v7  ;;  %2851 = vmatpush1.bf16.msra.mxu0 %v2621_v8 }
0x1063   :  { %2811 = vmatprep.subr.bf16.mxu1 %v2628_v51  ;;  %2852 = vmatprep.subr.bf16.mxu0 %v2630_v56 }
0x1066   :  { %2812 = vmatpush1.bf16.msra.mxu1 %v2627_v57  ;;  %2853 = vmatpush1.bf16.msra.mxu0 %v2629_v58 }
0x1067   :  { %2813 = vmatprep.subr.bf16.mxu1 %v2636_v59  ;;  %2854 = vmatprep.subr.bf16.mxu0 %v2638_v61 }
0x106a   :  { %2814 = vmatpush1.bf16.msra.mxu1 %v2635_v25  ;;  %2855 = vmatpush1.bf16.msra.mxu0 %v2637_v62 }
0x106b   :  { %2815 = vmatprep.subr.bf16.mxu1 %v2644_v0  ;;  %2856 = vmatprep.subr.bf16.mxu0 %v2646_v28 }
0x106e   :  { %2816 = vmatpush1.bf16.msra.mxu1 %v2643_v1  ;;  %2857 = vmatpush1.bf16.msra.mxu0 %v2645_v3 }
0x106f   :  { %2817 = vmatprep.subr.bf16.mxu1 %v2652_v4  ;;  %2858 = vmatprep.subr.bf16.mxu0 %v2654_v9 }
0x1072   :  { %2818 = vmatpush1.bf16.msra.mxu1 %v2651_v10  ;;  %2859 = vmatpush1.bf16.msra.mxu0 %v2653_v12 }
0x1073   :  { %2819 = vmatprep.subr.bf16.mxu1 %v2660_v13  ;;  %2860 = vmatprep.subr.bf16.mxu0 %v2662_v14 }
0x1076   :  { %2820 = vmatpush1.bf16.msra.mxu1 %v2659_v15  ;;  %2861 = vmatpush1.bf16.msra.mxu0 %v2661_v60 }
0x1079   :  { %2822 = vmatmul.mubr.bf16.vlgmr.msra.gmra.mrb[44].mxu1 %v4245_v48  ;;  %2863 = vmatmul.mubr.bf16.vlgmr.msra.gmra.mrb[12].mxu0 %v4245_v48 }
0x110c   :  { %v2741_v20 = vpop.f32.mrb[40].mxu1  ;;  %v2782_v21 = vpop.f32.mrb[8].mxu0 }
0x110d   :  { %v2742_v22 = vadd.f32 %v2741_v20, %v2670_v54  ;;  %v2783_v2 = vadd.f32 %v2782_v21, %v2678_v40  ;;  %v2743_v42 = vpop.f32.mrb[41].mxu1  ;;  %v2784_v48 = vpop.f32.mrb[9].mxu0 }
0x110e   :  { %v2744_v11 = vadd.f32 %v2743_v42, %v2674_v19  ;;  %v2785_v23 = vadd.f32 %v2784_v48, %v2682_v63  ;;  %v2745_v24 = vpop.f32.mrb[42].mxu1  ;;  %v2786_v26 = vpop.f32.mrb[10].mxu0 }
0x110f   :  { %2871 = vst [vmem:[#allocation7] sm:$0xff] %v2742_v22  ;;  %2873 = vst [vmem:[#allocation7 + $0x10] sm:$0xff] %v2783_v2  ;;  %v2746_v27 = vpop.f32.mrb[43].mxu1  ;;  %v2787_v29 = vpop.f32.mrb[11].mxu0 }
0x1110   :  { %2872 = vst [vmem:[#allocation7 + $0x8] sm:$0xff] %v2744_v11  ;;  %2874 = vst [vmem:[#allocation7 + $0x18] sm:$0xff] %v2785_v23 }
0x114c   :  { %v2823_v34 = vpop.f32.mrb[44].mxu1  ;;  %v2864_v35 = vpop.f32.mrb[12].mxu0 }
0x114d   :  { %v2824_v36 = vadd.f32 %v2823_v34, %v2686_v31  ;;  %v2865_v37 = vadd.f32 %v2864_v35, %v2694_v32  ;;  %v2825_v38 = vpop.f32.mrb[45].mxu1  ;;  %v2866_v39 = vpop.f32.mrb[13].mxu0 }
0x114e   :  { %v2826_v5 = vadd.f32 %v2825_v38, %v2690_v49  ;;  %v2867_v6 = vadd.f32 %v2866_v39, %v2698_v33  ;;  %v2827_v43 = vpop.f32.mrb[46].mxu1  ;;  %v2868_v44 = vpop.f32.mrb[14].mxu0 }
0x114f   :  { %2875 = vst [vmem:[#allocation7 + $0x20] sm:$0xff] %v2824_v36  ;;  %2877 = vst [vmem:[#allocation7 + $0x30] sm:$0xff] %v2865_v37  ;;  %v2828_v52 = vpop.f32.mrb[47].mxu1  ;;  %v2869_v45 = vpop.f32.mrb[15].mxu0 }
0x1150   :  { %2876 = vst [vmem:[#allocation7 + $0x28] sm:$0xff] %v2826_v5  ;;  %2878 = vst [vmem:[#allocation7 + $0x38] sm:$0xff] %v2867_v6 }
0x1151   :  { %3687 = shalt.err (!%p3684_p12)
}
0x1152   :  { %s3688_s20 = scalar_lea.hbm %s4282_s8, 1024 }
0x1153   :  { %p3689_p13 = scmp.ne.s32.totalorder %s4282_s8, %s3688_s20  ;;  %p3692_p0 = scmp.lt.u32.totalorder %s3688_s20, %s4282_s8 }
0x1155   :  { %p3694_p1 = pnand %p3692_p0, %p3689_p13 }
0x1157   :  { %3697 = shalt.err (!%p3694_p1)
}
0x1158   :  { %2888 = dma.vmem_to_hbm [thread:$0]  %s2886_s17, 1024, %s4282_s8, [#allocation6]  }
0x1159   :  { %3702 = dma.done.wait [#allocation6], 1024  }
0x115a   :  { %3703 = vsyncadd [#allocation6], 4294966272 }
0x115b   :  { %2896 = vsyncpa [#allocation5], 1 }
0x115c   :  { %2897 = vsyncpa [#allocation6], 1 }
0x115d   :  { %2898 = vsyncmov [#allocation3] }
0x1160   :  { %s2899_s25 = vpop.sfrf %2898 }
0x1161   :  { %p3132_p2 = scmp.ne.s32.totalorder %s2899_s25, 0 }
0x1163   :  { %2903 = shalt.err (%p3132_p2)  }

</bundles_post_ra>
